<compile_context>
chip_gen: v6e
topology: v6e:2x2x1
jax: 0.10.0
libtpu: 0.0.40
codegen_flags: <defaults>
</compile_context>

<pallas_src>
import jax
import jax.numpy as jnp
import numpy as np
from jax.experimental import pallas as pl
from jax.experimental.pallas import tpu as pltpu  # noqa: F401  (TPU backend)

# ----------------------------- model config ---------------------------------
VOCAB = 64
HIDDEN = 32
NUM_HEADS = 2
HEAD_DIM = HIDDEN // NUM_HEADS
INTERMEDIATE = 64
NUM_LAYERS = 2
NUM_LABELS = 5
BATCH = 2
SEQ = 8
LN_EPS = 1e-12
LPAD = 128            # lane-dense padded width (classifier / CE / stats / slab)
NEG_INF = -1e9

# -------- packed-weight slab layout: one lane-dense (TOTAL_ROWS, 128) array --
CLS_W_ROW = 0                          # (HIDDEN, NUM_LABELS)
CLS_B_ROW = CLS_W_ROW + HIDDEN         # (1, NUM_LABELS)
EMB_G_ROW = CLS_B_ROW + 1              # (1, HIDDEN)
EMB_B_ROW = EMB_G_ROW + 1              # (1, HIDDEN)
HEAD_ROWS = 40                         # padded so layer blocks start 8-aligned
# per-layer offsets (matrices at multiples of 8, biases/LN params after)
WQKV_OFF = 0                           # (HIDDEN, 3*HIDDEN)
WO_OFF = WQKV_OFF + HIDDEN             # (HIDDEN, HIDDEN)
W1_OFF = WO_OFF + HIDDEN               # (HIDDEN, INTERMEDIATE)
W2_OFF = W1_OFF + HIDDEN               # (INTERMEDIATE, HIDDEN)
BQKV_OFF = W2_OFF + INTERMEDIATE       # (1, 3*HIDDEN)
BO_OFF = BQKV_OFF + 1
B1_OFF = BO_OFF + 1
B2_OFF = B1_OFF + 1
G1_OFF = B2_OFF + 1
BE1_OFF = G1_OFF + 1
G2_OFF = BE1_OFF + 1
BE2_OFF = G2_OFF + 1
LAYER_ROWS = BE2_OFF + 1               # 168
TOTAL_ROWS = HEAD_ROWS + NUM_LAYERS * LAYER_ROWS   # 376


def _layernorm(x, gamma, beta, eps=LN_EPS):
    mu = jnp.mean(x, axis=-1, keepdims=True)
    var = jnp.mean((x - mu) ** 2, axis=-1, keepdims=True)
    return (x - mu) * jax.lax.rsqrt(var + eps) * gamma + beta


# -------------------- Pallas kernel: full fused forward ----------------------
def fused_forward_kernel(emb_ref, mask_ref, labels_ref, w_ref,
                         logits_ref, stats_ref):
    f32 = jnp.float32
    B, S, H = emb_ref.shape
    LP = logits_ref.shape[-1]

    def wrow(r0, nrows, ncols=LPAD):   # static slab slice (zero-cost view + load)
        return w_ref[r0:r0 + nrows, 0:ncols]

    x = _layernorm(emb_ref[...].astype(f32),
                   wrow(EMB_G_ROW, 1, HIDDEN), wrow(EMB_B_ROW, 1, HIDDEN))   # (B,S,H)

    mask = mask_ref[...].astype(f32)                     # (B, 1, S)
    bias = (1.0 - mask) * NEG_INF                        # hoisted out of the layer loop
    scale = 1.0 / (HEAD_DIM ** 0.5)

    for l in range(NUM_LAYERS):                          # static unroll over layers
        base = HEAD_ROWS + l * LAYER_ROWS
        wqkv = wrow(base + WQKV_OFF, HIDDEN, 3 * HIDDEN)         # (32, 96)
        bqkv = wrow(base + BQKV_OFF, 1, 3 * HIDDEN)              # (1, 96)
        wo = wrow(base + WO_OFF, HIDDEN, HIDDEN)                 # (32, 32)
        bo = wrow(base + BO_OFF, 1, HIDDEN)
        w1 = wrow(base + W1_OFF, HIDDEN, INTERMEDIATE)           # (32, 64)
        b1 = wrow(base + B1_OFF, 1, INTERMEDIATE)
        w2 = wrow(base + W2_OFF, INTERMEDIATE, HIDDEN)           # (64, 32)
        b2 = wrow(base + B2_OFF, 1, HIDDEN)
        g1, be1 = wrow(base + G1_OFF, 1, HIDDEN), wrow(base + BE1_OFF, 1, HIDDEN)
        g2, be2 = wrow(base + G2_OFF, 1, HIDDEN), wrow(base + BE2_OFF, 1, HIDDEN)

        # ---- attention: single fused QKV matmul on the flattened (B*S, H) slab
        xf = x.reshape(B * S, H)
        qkv = (jnp.dot(xf, wqkv, preferred_element_type=f32) + bqkv
               ).reshape(B, S, 3 * HIDDEN)                        # (B, S, 96)

        ctx_heads = []
        for h in range(NUM_HEADS):                       # static 16-lane head slices
            qh = qkv[..., h * HEAD_DIM:(h + 1) * HEAD_DIM]
            kh = qkv[..., HIDDEN + h * HEAD_DIM:HIDDEN + (h + 1) * HEAD_DIM]
            vh = qkv[..., 2 * HIDDEN + h * HEAD_DIM:2 * HIDDEN + (h + 1) * HEAD_DIM]
            s = jnp.einsum('bqd,bkd->bqk', qh, kh,
                           preferred_element_type=f32) * scale + bias
            m = jnp.max(s, axis=-1, keepdims=True)
            p = jnp.exp(s - m)
            p = p * pl.reciprocal(jnp.sum(p, axis=-1, keepdims=True), approx=True)
            ctx_heads.append(jnp.einsum('bqk,bkd->bqd', p, vh,
                                        preferred_element_type=f32))
        ctx = jnp.concatenate(ctx_heads, axis=-1)                 # (B, S, H)

        attn = (jnp.dot(ctx.reshape(B * S, H), wo, preferred_element_type=f32)
                + bo).reshape(B, S, H)
        h1 = _layernorm(x + attn, g1, be1)

        # ---- feed-forward (flattened (B*S, H) matmuls) ----
        ff = jnp.dot(h1.reshape(B * S, H), w1, preferred_element_type=f32) + b1
        # TODO(synk): HF BERT default is exact erf-GELU; tanh approximation kept
        # to match the in-file reference numerics.
        ff = jax.nn.gelu(ff, approximate=True)
        ff = (jnp.dot(ff, w2, preferred_element_type=f32) + b2).reshape(B, S, H)
        x = _layernorm(h1 + ff, g2, be2)

    # ---- classifier head (lane-dense, padded to LPAD labels) ----
    cls_w = wrow(CLS_W_ROW, HIDDEN)                               # (32, 128), pad lanes zero
    cls_b = wrow(CLS_B_ROW, 1)                                    # (1, 128)
    logits = (jnp.dot(x.reshape(B * S, H), cls_w, preferred_element_type=f32)
              + cls_b).reshape(B, S, LP)
    logits_ref[...] = logits.astype(logits_ref.dtype)

    # ---- per-instance cross-entropy reduction (ignore_index = -100) ----
    labels = labels_ref[...]                                      # (B, S, 1) int32
    lane = jax.lax.broadcasted_iota(jnp.int32, (B, S, LP), 2)
    z = jnp.where(lane < NUM_LABELS, logits, NEG_INF)             # mask padded label lanes
    zm = jnp.max(z, axis=-1, keepdims=True)
    e = jnp.exp(z - zm)
    lse = jnp.log(jnp.sum(e, axis=-1, keepdims=True))
    logp = z - zm - lse
    onehot = lane == labels                                       # -100 matches no lane
    per_tok = -jnp.sum(jnp.where(onehot, logp, 0.0), axis=-1, keepdims=True)  # (B,S,1)
    valid_tok = (labels != -100).astype(f32)                                   # (B,S,1)
    ce_sum = jnp.sum(per_tok, axis=1, keepdims=True)               # (B,1,1)
    valid = jnp.sum(valid_tok, axis=1, keepdims=True)              # (B,1,1)

    lane_s = jax.lax.broadcasted_iota(jnp.int32, (B, 1, LP), 2)
    stats = jnp.where(lane_s == 0, ce_sum, jnp.where(lane_s == 1, valid, 0.0))
    stats_ref[...] = stats.astype(stats_ref.dtype)                 # lane-dense stats slab


# --------------------------- parameter packing --------------------------------
def pack_params(params):
    """One-time packing of all weights into a single lane-dense f32 slab."""
    def pad_lanes(x):
        x = jnp.asarray(x, jnp.float32)
        return jnp.pad(x, ((0, 0), (0, LPAD - x.shape[1])))

    blocks = [pad_lanes(params["cls_w"]),
              pad_lanes(params["cls_b"]),
              pad_lanes(params["emb_gamma"]),
              pad_lanes(params["emb_beta"]),
              jnp.zeros((HEAD_ROWS - EMB_B_ROW - 1, LPAD), jnp.float32)]
    for lp in params["layers"]:
        wqkv = jnp.concatenate([lp["wq"], lp["wk"], lp["wv"]], axis=1)   # (H, 3H)
        bqkv = jnp.concatenate([lp["bq"], lp["bk"], lp["bv"]], axis=1)   # (1, 3H)
        blocks += [pad_lanes(wqkv), pad_lanes(lp["wo"]), pad_lanes(lp["w1"]),
                   pad_lanes(lp["w2"]), pad_lanes(bqkv), pad_lanes(lp["bo"]),
                   pad_lanes(lp["b1"]), pad_lanes(lp["b2"]), pad_lanes(lp["g1"]),
                   pad_lanes(lp["be1"]), pad_lanes(lp["g2"]), pad_lanes(lp["be2"])]
    wslab = jnp.concatenate(blocks, axis=0)
    assert wslab.shape == (TOTAL_ROWS, LPAD)
    return {"wslab": wslab, "word_emb": params["word_emb"], "pos_emb": params["pos_emb"]}


# ------------------------------- full forward ---------------------------------
@jax.jit
def _forward_impl(packed, input_ids, attention_mask, labels, weight):
    B, S = input_ids.shape
    if attention_mask is None:
        attention_mask = jnp.ones((B, S), jnp.float32)

    # TODO(synk): embedding-table gather stays in (jitted) JAX glue; everything
    # downstream (LN, encoder layers, classifier, CE reduction) is in-kernel.
    emb = packed["word_emb"][input_ids] + packed["pos_emb"][None, :S]   # (B, S, H)
    mask3 = attention_mask.astype(jnp.float32)[:, None, :]              # (B, 1, S)

    has_labels = labels is not None
    lab = labels.astype(jnp.int32) if has_labels else jnp.full((B, S), -100, jnp.int32)
    lab3 = lab[:, :, None]                                               # (B, S, 1)

    logits_pad, stats = pl.pallas_call(
        fused_forward_kernel,
        out_shape=(jax.ShapeDtypeStruct((B, S, LPAD), jnp.float32),
                   jax.ShapeDtypeStruct((B, 1, LPAD), jnp.float32)),
    )(emb, mask3, lab3, packed["wslab"])

    logits = logits_pad[:, :, :NUM_LABELS]

    loss = None
    if has_labels:
        ce_sum = stats[:, 0, 0]                  # per-instance masked CE sum
        valid = stats[:, 0, 1]                   # per-instance valid-token count
        if weight is not None:
            per_inst = ce_sum / valid
            loss = jnp.mean(per_inst * weight.astype(jnp.float32))
        else:
            loss = jnp.sum(ce_sum) / jnp.sum(valid)   # HF default pooled CE
    return {"loss": loss, "logits": logits}


def hf_token_classifier_forward(packed, input_ids, attention_mask=None,
                                labels=None, weight=None):
    return _forward_impl(packed, input_ids, attention_mask, labels, weight)


# --------------------------- pure-JAX reference ------------------------------
def _ref_forward(params, input_ids, attention_mask, labels, weight):
    with jax.default_matmul_precision("highest"):
        B, S = input_ids.shape
        emb = params["word_emb"][input_ids] + params["pos_emb"][None, :S]
        x = _layernorm(emb, params["emb_gamma"], params["emb_beta"])
        bias = (1.0 - attention_mask.astype(jnp.float32))[:, None, :] * NEG_INF
        for lp in params["layers"]:
            q = jnp.einsum("bsh,hk->bsk", x, lp["wq"]) + lp["bq"]
            k = jnp.einsum("bsh,hk->bsk", x, lp["wk"]) + lp["bk"]
            v = jnp.einsum("bsh,hk->bsk", x, lp["wv"]) + lp["bv"]
            ctxs = []
            for h in range(NUM_HEADS):
                sl = slice(h * HEAD_DIM, (h + 1) * HEAD_DIM)
                s = jnp.einsum("bqd,bkd->bqk", q[..., sl], k[..., sl]) / (HEAD_DIM ** 0.5)
                p = jax.nn.softmax(s + bias, axis=-1)
                ctxs.append(jnp.einsum("bqk,bkd->bqd", p, v[..., sl]))
            ctx = jnp.concatenate(ctxs, axis=-1)
            attn_out = jnp.einsum("bsh,hk->bsk", ctx, lp["wo"]) + lp["bo"]
            h1 = _layernorm(x + attn_out, lp["g1"], lp["be1"])
            ff = jax.nn.gelu(jnp.einsum("bsh,hk->bsk", h1, lp["w1"]) + lp["b1"],
                             approximate=True)
            ff = jnp.einsum("bsh,hk->bsk", ff, lp["w2"]) + lp["b2"]
            x = _layernorm(h1 + ff, lp["g2"], lp["be2"])
        logits = jnp.einsum("bsh,hl->bsl", x, params["cls_w"]) + params["cls_b"]
        logp = jax.nn.log_softmax(logits, axis=-1)
        safe = jnp.where(labels == -100, 0, labels)
        per_tok = -jnp.take_along_axis(logp, safe[..., None], axis=-1)[..., 0]
        valid = (labels != -100).astype(jnp.float32)
        per_inst = (per_tok * valid).sum(1) / valid.sum(1)
        weighted_loss = jnp.mean(per_inst * weight)
        default_loss = (per_tok * valid).sum() / valid.sum()
        return logits, weighted_loss, default_loss


# -------------------------------- params -------------------------------------
def init_params(key):
    keys = jax.random.split(key, 3 + NUM_LAYERS)
    dense = lambda k, shape: jax.random.normal(k, shape, jnp.float32) * 0.02
    params = {
        "word_emb": dense(keys[0], (VOCAB, HIDDEN)),
        "pos_emb": dense(keys[1], (SEQ, HIDDEN)),
        "emb_gamma": jnp.ones((1, HIDDEN), jnp.float32),
        "emb_beta": jnp.zeros((1, HIDDEN), jnp.float32),
        "cls_w": dense(keys[2], (HIDDEN, NUM_LABELS)),
        "cls_b": jnp.zeros((1, NUM_LABELS), jnp.float32),
        "layers": [],
    }
    for l in range(NUM_LAYERS):
        lk = jax.random.split(keys[3 + l], 6)
        params["layers"].append({
            "wq": dense(lk[0], (HIDDEN, HIDDEN)), "bq": jnp.zeros((1, HIDDEN), jnp.float32),
            "wk": dense(lk[1], (HIDDEN, HIDDEN)), "bk": jnp.zeros((1, HIDDEN), jnp.float32),
            "wv": dense(lk[2], (HIDDEN, HIDDEN)), "bv": jnp.zeros((1, HIDDEN), jnp.float32),
            "wo": dense(lk[3], (HIDDEN, HIDDEN)), "bo": jnp.zeros((1, HIDDEN), jnp.float32),
            "g1": jnp.ones((1, HIDDEN), jnp.float32), "be1": jnp.zeros((1, HIDDEN), jnp.float32),
            "w1": dense(lk[4], (HIDDEN, INTERMEDIATE)),
            "b1": jnp.zeros((1, INTERMEDIATE), jnp.float32),
            "w2": dense(lk[5], (INTERMEDIATE, HIDDEN)),
            "b2": jnp.zeros((1, HIDDEN), jnp.float32),
            "g2": jnp.ones((1, HIDDEN), jnp.float32), "be2": jnp.zeros((1, HIDDEN), jnp.float32),
        })
    return params


# --------------------------------- main ---------------------------------------
if __name__ == "__main__":
    root = jax.random.PRNGKey(0)
    kp, ki, kl = jax.random.split(root, 3)
    params = init_params(kp)
    packed = pack_params(params)          # hoisted: packed once, reused per call

    input_ids = jax.random.randint(ki, (BATCH, SEQ), 0, VOCAB, dtype=jnp.int32)
    attention_mask = jnp.array([[1] * SEQ, [1] * (SEQ - 2) + [0, 0]], jnp.float32)
    labels = jax.random.randint(kl, (BATCH, SEQ), 0, NUM_LABELS, dtype=jnp.int32)
    labels = jnp.where(attention_mask > 0, labels, -100)     # ignore padded tokens
    weight = jnp.array([0.3, 0.7], jnp.float32)

    # weighted per-instance loss path
    out = hf_token_classifier_forward(packed, input_ids, attention_mask,
                                      labels=labels, weight=weight)
    logits = jax.block_until_ready(out["logits"])
    loss = jax.block_until_ready(out["loss"])

    # HF-default (unweighted, pooled) loss path
    out_default = hf_token_classifier_forward(packed, input_ids, attention_mask,
                                              labels=labels, weight=None)
    default_loss = jax.block_until_ready(out_default["loss"])

    # correctness check against a pure-JAX reference
    ref_logits, ref_wloss, ref_dloss = _ref_forward(params, input_ids, attention_mask,
                                                    labels, weight)
    np.testing.assert_allclose(np.asarray(logits), np.asarray(ref_logits),
                               rtol=2e-2, atol=1e-3)
    np.testing.assert_allclose(float(loss), float(ref_wloss), rtol=2e-2, atol=1e-3)
    np.testing.assert_allclose(float(default_loss), float(ref_dloss), rtol=2e-2, atol=1e-3)

    print("KERNEL_OK")
</pallas_src>

<mosaic_0001>
module attributes {stable_mosaic.version = 11 : i64} {
  func.func @fused_forward_kernel(%arg0: memref<2x8x32xf32, #tpu.memory_space<vmem>>, %arg1: memref<2x1x8xf32, #tpu.memory_space<vmem>>, %arg2: memref<2x8x1xi32, #tpu.memory_space<vmem>>, %arg3: memref<376x128xf32, #tpu.memory_space<vmem>>, %arg4: memref<2x8x128xf32, #tpu.memory_space<vmem>>, %arg5: memref<2x1x128xf32, #tpu.memory_space<vmem>>) attributes {dimension_semantics = [], scalar_prefetch = 0 : i64, scratch_operands = 0 : i64, tpu.core_type = #tpu.core_type<tc>} {
    %c0 = arith.constant 0 : index
    %c0_0 = arith.constant 0 : index
    %c0_1 = arith.constant 0 : index
    %0 = vector.load %arg0[%c0, %c0_0, %c0_1] : memref<2x8x32xf32, #tpu.memory_space<vmem>>, vector<2x8x32xf32>
    %c33 = arith.constant 33 : index
    %c0_2 = arith.constant 0 : index
    %1 = vector.load %arg3[%c33, %c0_2] : memref<376x128xf32, #tpu.memory_space<vmem>>, vector<1x32xf32>
    %c34 = arith.constant 34 : index
    %c0_3 = arith.constant 0 : index
    %2 = vector.load %arg3[%c34, %c0_3] : memref<376x128xf32, #tpu.memory_space<vmem>>, vector<1x32xf32>
    %cst = arith.constant dense<0.000000e+00> : vector<2x8xf32>
    %3 = vector.multi_reduction <add>, %0, %cst [2] : vector<2x8x32xf32> to vector<2x8xf32>
    %4 = vector.shape_cast %3 : vector<2x8xf32> to vector<2x8x1xf32>
    %cst_4 = arith.constant 3.200000e+01 : f32
    %5 = vector.broadcast %cst_4 : f32 to vector<2x8x1xf32>
    %6 = arith.divf %4, %5 : vector<2x8x1xf32>
    %7 = vector.broadcast %6 : vector<2x8x1xf32> to vector<2x8x32xf32>
    %8 = arith.subf %0, %7 : vector<2x8x32xf32>
    %9 = arith.mulf %8, %8 : vector<2x8x32xf32>
    %cst_5 = arith.constant dense<0.000000e+00> : vector<2x8xf32>
    %10 = vector.multi_reduction <add>, %9, %cst_5 [2] : vector<2x8x32xf32> to vector<2x8xf32>
    %11 = vector.shape_cast %10 : vector<2x8xf32> to vector<2x8x1xf32>
    %cst_6 = arith.constant 3.200000e+01 : f32
    %12 = vector.broadcast %cst_6 : f32 to vector<2x8x1xf32>
    %13 = arith.divf %11, %12 : vector<2x8x1xf32>
    %14 = vector.broadcast %6 : vector<2x8x1xf32> to vector<2x8x32xf32>
    %15 = arith.subf %0, %14 : vector<2x8x32xf32>
    %cst_7 = arith.constant 9.99999996E-13 : f32
    %16 = vector.broadcast %cst_7 : f32 to vector<2x8x1xf32>
    %17 = arith.addf %13, %16 : vector<2x8x1xf32>
    %18 = math.rsqrt %17 : vector<2x8x1xf32>
    %19 = vector.broadcast %18 : vector<2x8x1xf32> to vector<2x8x32xf32>
    %20 = arith.mulf %15, %19 : vector<2x8x32xf32>
    %21 = vector.shape_cast %1 : vector<1x32xf32> to vector<1x1x32xf32>
    %22 = vector.broadcast %21 : vector<1x1x32xf32> to vector<2x8x32xf32>
    %23 = arith.mulf %20, %22 : vector<2x8x32xf32>
    %24 = vector.shape_cast %2 : vector<1x32xf32> to vector<1x1x32xf32>
    %25 = vector.broadcast %24 : vector<1x1x32xf32> to vector<2x8x32xf32>
    %26 = arith.addf %23, %25 : vector<2x8x32xf32>
    %c0_8 = arith.constant 0 : index
    %c0_9 = arith.constant 0 : index
    %c0_10 = arith.constant 0 : index
    %27 = vector.load %arg1[%c0_8, %c0_9, %c0_10] : memref<2x1x8xf32, #tpu.memory_space<vmem>>, vector<2x1x8xf32>
    %cst_11 = arith.constant 1.000000e+00 : f32
    %28 = vector.broadcast %cst_11 : f32 to vector<2x1x8xf32>
    %29 = arith.subf %28, %27 : vector<2x1x8xf32>
    %cst_12 = arith.constant -1.000000e+09 : f32
    %30 = vector.broadcast %cst_12 : f32 to vector<2x1x8xf32>
    %31 = arith.mulf %29, %30 : vector<2x1x8xf32>
    %c40 = arith.constant 40 : index
    %c0_13 = arith.constant 0 : index
    %32 = vector.load %arg3[%c40, %c0_13] : memref<376x128xf32, #tpu.memory_space<vmem>>, vector<32x96xf32>
    %c200 = arith.constant 200 : index
    %c0_14 = arith.constant 0 : index
    %33 = vector.load %arg3[%c200, %c0_14] : memref<376x128xf32, #tpu.memory_space<vmem>>, vector<1x96xf32>
    %c72 = arith.constant 72 : index
    %c0_15 = arith.constant 0 : index
    %34 = vector.load %arg3[%c72, %c0_15] : memref<376x128xf32, #tpu.memory_space<vmem>>, vector<32x32xf32>
    %c201 = arith.constant 201 : index
    %c0_16 = arith.constant 0 : index
    %35 = vector.load %arg3[%c201, %c0_16] : memref<376x128xf32, #tpu.memory_space<vmem>>, vector<1x32xf32>
    %c104 = arith.constant 104 : index
    %c0_17 = arith.constant 0 : index
    %36 = vector.load %arg3[%c104, %c0_17] : memref<376x128xf32, #tpu.memory_space<vmem>>, vector<32x64xf32>
    %c202 = arith.constant 202 : index
    %c0_18 = arith.constant 0 : index
    %37 = vector.load %arg3[%c202, %c0_18] : memref<376x128xf32, #tpu.memory_space<vmem>>, vector<1x64xf32>
    %c136 = arith.constant 136 : index
    %c0_19 = arith.constant 0 : index
    %38 = vector.load %arg3[%c136, %c0_19] : memref<376x128xf32, #tpu.memory_space<vmem>>, vector<64x32xf32>
    %c203 = arith.constant 203 : index
    %c0_20 = arith.constant 0 : index
    %39 = vector.load %arg3[%c203, %c0_20] : memref<376x128xf32, #tpu.memory_space<vmem>>, vector<1x32xf32>
    %c204 = arith.constant 204 : index
    %c0_21 = arith.constant 0 : index
    %40 = vector.load %arg3[%c204, %c0_21] : memref<376x128xf32, #tpu.memory_space<vmem>>, vector<1x32xf32>
    %c205 = arith.constant 205 : index
    %c0_22 = arith.constant 0 : index
    %41 = vector.load %arg3[%c205, %c0_22] : memref<376x128xf32, #tpu.memory_space<vmem>>, vector<1x32xf32>
    %c206 = arith.constant 206 : index
    %c0_23 = arith.constant 0 : index
    %42 = vector.load %arg3[%c206, %c0_23] : memref<376x128xf32, #tpu.memory_space<vmem>>, vector<1x32xf32>
    %c207 = arith.constant 207 : index
    %c0_24 = arith.constant 0 : index
    %43 = vector.load %arg3[%c207, %c0_24] : memref<376x128xf32, #tpu.memory_space<vmem>>, vector<1x32xf32>
    %44 = vector.shape_cast %26 : vector<2x8x32xf32> to vector<16x32xf32>
    %cst_25 = arith.constant dense<0.000000e+00> : vector<16x96xf32>
    %45 = tpu.matmul %44, %32, %cst_25 {dimension_numbers = #tpu.dot_dimension_numbers<[1], [0], [0], [1], [0, 0, 1, 1], [], []>} : vector<16x32xf32>, vector<32x96xf32>, vector<16x96xf32> -> vector<16x96xf32>
    %46 = vector.broadcast %33 : vector<1x96xf32> to vector<16x96xf32>
    %47 = arith.addf %45, %46 : vector<16x96xf32>
    %48 = vector.shape_cast %47 : vector<16x96xf32> to vector<2x8x96xf32>
    %49 = vector.extract_strided_slice %48 {offsets = [0, 0, 0], sizes = [2, 8, 16], strides = [1, 1, 1]} : vector<2x8x96xf32> to vector<2x8x16xf32>
    %50 = vector.extract_strided_slice %48 {offsets = [0, 0, 32], sizes = [2, 8, 16], strides = [1, 1, 1]} : vector<2x8x96xf32> to vector<2x8x16xf32>
    %51 = vector.extract_strided_slice %48 {offsets = [0, 0, 64], sizes = [2, 8, 16], strides = [1, 1, 1]} : vector<2x8x96xf32> to vector<2x8x16xf32>
    "tpu.trace_start"() <{level = 10 : i32, message = "bqd,bkd->bqk"}> : () -> ()
    %cst_26 = arith.constant dense<0.000000e+00> : vector<2x8x8xf32>
    %52 = tpu.matmul %49, %50, %cst_26 {dimension_numbers = #tpu.dot_dimension_numbers<[2], [2], [1], [1], [0, 0, 0, 1, 1, 1], [0], [0]>} : vector<2x8x16xf32>, vector<2x8x16xf32>, vector<2x8x8xf32> -> vector<2x8x8xf32>
    "tpu.trace_stop"() : () -> ()
    %cst_27 = arith.constant 2.500000e-01 : f32
    %53 = vector.broadcast %cst_27 : f32 to vector<2x8x8xf32>
    %54 = arith.mulf %52, %53 : vector<2x8x8xf32>
    %55 = vector.broadcast %31 : vector<2x1x8xf32> to vector<2x8x8xf32>
    %56 = arith.addf %54, %55 : vector<2x8x8xf32>
    %cst_28 = arith.constant dense<0xFF800000> : vector<2x8xf32>
    %57 = vector.multi_reduction <maximumf>, %56, %cst_28 [2] : vector<2x8x8xf32> to vector<2x8xf32>
    %58 = vector.shape_cast %57 : vector<2x8xf32> to vector<2x8x1xf32>
    %59 = vector.broadcast %58 : vector<2x8x1xf32> to vector<2x8x8xf32>
    %60 = arith.subf %56, %59 : vector<2x8x8xf32>
    %61 = math.exp %60 : vector<2x8x8xf32>
    %cst_29 = arith.constant dense<0.000000e+00> : vector<2x8xf32>
    %62 = vector.multi_reduction <add>, %61, %cst_29 [2] : vector<2x8x8xf32> to vector<2x8xf32>
    %63 = vector.shape_cast %62 : vector<2x8xf32> to vector<2x8x1xf32>
    %64 = tpu.reciprocal %63 {approx = true} : vector<2x8x1xf32> -> vector<2x8x1xf32>
    %65 = vector.broadcast %64 : vector<2x8x1xf32> to vector<2x8x8xf32>
    %66 = arith.mulf %61, %65 : vector<2x8x8xf32>
    "tpu.trace_start"() <{level = 10 : i32, message = "bqk,bkd->bqd"}> : () -> ()
    %cst_30 = arith.constant dense<0.000000e+00> : vector<2x8x16xf32>
    %67 = tpu.matmul %66, %51, %cst_30 {dimension_numbers = #tpu.dot_dimension_numbers<[2], [1], [1], [2], [0, 0, 0, 1, 1, 2], [0], [0]>} : vector<2x8x8xf32>, vector<2x8x16xf32>, vector<2x8x16xf32> -> vector<2x8x16xf32>
    "tpu.trace_stop"() : () -> ()
    %68 = vector.extract_strided_slice %48 {offsets = [0, 0, 16], sizes = [2, 8, 16], strides = [1, 1, 1]} : vector<2x8x96xf32> to vector<2x8x16xf32>
    %69 = vector.extract_strided_slice %48 {offsets = [0, 0, 48], sizes = [2, 8, 16], strides = [1, 1, 1]} : vector<2x8x96xf32> to vector<2x8x16xf32>
    %70 = vector.extract_strided_slice %48 {offsets = [0, 0, 80], sizes = [2, 8, 16], strides = [1, 1, 1]} : vector<2x8x96xf32> to vector<2x8x16xf32>
    "tpu.trace_start"() <{level = 10 : i32, message = "bqd,bkd->bqk"}> : () -> ()
    %cst_31 = arith.constant dense<0.000000e+00> : vector<2x8x8xf32>
    %71 = tpu.matmul %68, %69, %cst_31 {dimension_numbers = #tpu.dot_dimension_numbers<[2], [2], [1], [1], [0, 0, 0, 1, 1, 1], [0], [0]>} : vector<2x8x16xf32>, vector<2x8x16xf32>, vector<2x8x8xf32> -> vector<2x8x8xf32>
    "tpu.trace_stop"() : () -> ()
    %cst_32 = arith.constant 2.500000e-01 : f32
    %72 = vector.broadcast %cst_32 : f32 to vector<2x8x8xf32>
    %73 = arith.mulf %71, %72 : vector<2x8x8xf32>
    %74 = vector.broadcast %31 : vector<2x1x8xf32> to vector<2x8x8xf32>
    %75 = arith.addf %73, %74 : vector<2x8x8xf32>
    %cst_33 = arith.constant dense<0xFF800000> : vector<2x8xf32>
    %76 = vector.multi_reduction <maximumf>, %75, %cst_33 [2] : vector<2x8x8xf32> to vector<2x8xf32>
    %77 = vector.shape_cast %76 : vector<2x8xf32> to vector<2x8x1xf32>
    %78 = vector.broadcast %77 : vector<2x8x1xf32> to vector<2x8x8xf32>
    %79 = arith.subf %75, %78 : vector<2x8x8xf32>
    %80 = math.exp %79 : vector<2x8x8xf32>
    %cst_34 = arith.constant dense<0.000000e+00> : vector<2x8xf32>
    %81 = vector.multi_reduction <add>, %80, %cst_34 [2] : vector<2x8x8xf32> to vector<2x8xf32>
    %82 = vector.shape_cast %81 : vector<2x8xf32> to vector<2x8x1xf32>
    %83 = tpu.reciprocal %82 {approx = true} : vector<2x8x1xf32> -> vector<2x8x1xf32>
    %84 = vector.broadcast %83 : vector<2x8x1xf32> to vector<2x8x8xf32>
    %85 = arith.mulf %80, %84 : vector<2x8x8xf32>
    "tpu.trace_start"() <{level = 10 : i32, message = "bqk,bkd->bqd"}> : () -> ()
    %cst_35 = arith.constant dense<0.000000e+00> : vector<2x8x16xf32>
    %86 = tpu.matmul %85, %70, %cst_35 {dimension_numbers = #tpu.dot_dimension_numbers<[2], [1], [1], [2], [0, 0, 0, 1, 1, 2], [0], [0]>} : vector<2x8x8xf32>, vector<2x8x16xf32>, vector<2x8x16xf32> -> vector<2x8x16xf32>
    "tpu.trace_stop"() : () -> ()
    %87 = tpu.concatenate %67, %86 in 2 : vector<2x8x16xf32>, vector<2x8x16xf32> -> vector<2x8x32xf32>
    %88 = vector.shape_cast %87 : vector<2x8x32xf32> to vector<16x32xf32>
    %cst_36 = arith.constant dense<0.000000e+00> : vector<16x32xf32>
    %89 = tpu.matmul %88, %34, %cst_36 {dimension_numbers = #tpu.dot_dimension_numbers<[1], [0], [0], [1], [0, 0, 1, 1], [], []>} : vector<16x32xf32>, vector<32x32xf32>, vector<16x32xf32> -> vector<16x32xf32>
    %90 = vector.broadcast %35 : vector<1x32xf32> to vector<16x32xf32>
    %91 = arith.addf %89, %90 : vector<16x32xf32>
    %92 = vector.shape_cast %91 : vector<16x32xf32> to vector<2x8x32xf32>
    %93 = arith.addf %26, %92 : vector<2x8x32xf32>
    %cst_37 = arith.constant dense<0.000000e+00> : vector<2x8xf32>
    %94 = vector.multi_reduction <add>, %93, %cst_37 [2] : vector<2x8x32xf32> to vector<2x8xf32>
    %95 = vector.shape_cast %94 : vector<2x8xf32> to vector<2x8x1xf32>
    %cst_38 = arith.constant 3.200000e+01 : f32
    %96 = vector.broadcast %cst_38 : f32 to vector<2x8x1xf32>
    %97 = arith.divf %95, %96 : vector<2x8x1xf32>
    %98 = vector.broadcast %97 : vector<2x8x1xf32> to vector<2x8x32xf32>
    %99 = arith.subf %93, %98 : vector<2x8x32xf32>
    %100 = arith.mulf %99, %99 : vector<2x8x32xf32>
    %cst_39 = arith.constant dense<0.000000e+00> : vector<2x8xf32>
    %101 = vector.multi_reduction <add>, %100, %cst_39 [2] : vector<2x8x32xf32> to vector<2x8xf32>
    %102 = vector.shape_cast %101 : vector<2x8xf32> to vector<2x8x1xf32>
    %cst_40 = arith.constant 3.200000e+01 : f32
    %103 = vector.broadcast %cst_40 : f32 to vector<2x8x1xf32>
    %104 = arith.divf %102, %103 : vector<2x8x1xf32>
    %105 = vector.broadcast %97 : vector<2x8x1xf32> to vector<2x8x32xf32>
    %106 = arith.subf %93, %105 : vector<2x8x32xf32>
    %cst_41 = arith.constant 9.99999996E-13 : f32
    %107 = vector.broadcast %cst_41 : f32 to vector<2x8x1xf32>
    %108 = arith.addf %104, %107 : vector<2x8x1xf32>
    %109 = math.rsqrt %108 : vector<2x8x1xf32>
    %110 = vector.broadcast %109 : vector<2x8x1xf32> to vector<2x8x32xf32>
    %111 = arith.mulf %106, %110 : vector<2x8x32xf32>
    %112 = vector.shape_cast %40 : vector<1x32xf32> to vector<1x1x32xf32>
    %113 = vector.broadcast %112 : vector<1x1x32xf32> to vector<2x8x32xf32>
    %114 = arith.mulf %111, %113 : vector<2x8x32xf32>
    %115 = vector.shape_cast %41 : vector<1x32xf32> to vector<1x1x32xf32>
    %116 = vector.broadcast %115 : vector<1x1x32xf32> to vector<2x8x32xf32>
    %117 = arith.addf %114, %116 : vector<2x8x32xf32>
    %118 = vector.shape_cast %117 : vector<2x8x32xf32> to vector<16x32xf32>
    %cst_42 = arith.constant dense<0.000000e+00> : vector<16x64xf32>
    %119 = tpu.matmul %118, %36, %cst_42 {dimension_numbers = #tpu.dot_dimension_numbers<[1], [0], [0], [1], [0, 0, 1, 1], [], []>} : vector<16x32xf32>, vector<32x64xf32>, vector<16x64xf32> -> vector<16x64xf32>
    %120 = vector.broadcast %37 : vector<1x64xf32> to vector<16x64xf32>
    %121 = arith.addf %119, %120 : vector<16x64xf32>
    %122 = arith.mulf %121, %121 : vector<16x64xf32>
    %123 = arith.mulf %121, %122 : vector<16x64xf32>
    %cst_43 = arith.constant 4.471500e-02 : f32
    %124 = vector.broadcast %cst_43 : f32 to vector<16x64xf32>
    %125 = arith.mulf %124, %123 : vector<16x64xf32>
    %126 = arith.addf %121, %125 : vector<16x64xf32>
    %cst_44 = arith.constant 0.797884583 : f32
    %127 = vector.broadcast %cst_44 : f32 to vector<16x64xf32>
    %128 = arith.mulf %127, %126 : vector<16x64xf32>
    %129 = math.tanh %128 : vector<16x64xf32>
    %cst_45 = arith.constant 1.000000e+00 : f32
    %130 = vector.broadcast %cst_45 : f32 to vector<16x64xf32>
    %131 = arith.addf %130, %129 : vector<16x64xf32>
    %cst_46 = arith.constant 5.000000e-01 : f32
    %132 = vector.broadcast %cst_46 : f32 to vector<16x64xf32>
    %133 = arith.mulf %132, %131 : vector<16x64xf32>
    %134 = arith.mulf %121, %133 : vector<16x64xf32>
    %cst_47 = arith.constant dense<0.000000e+00> : vector<16x32xf32>
    %135 = tpu.matmul %134, %38, %cst_47 {dimension_numbers = #tpu.dot_dimension_numbers<[1], [0], [0], [1], [0, 0, 1, 1], [], []>} : vector<16x64xf32>, vector<64x32xf32>, vector<16x32xf32> -> vector<16x32xf32>
    %136 = vector.broadcast %39 : vector<1x32xf32> to vector<16x32xf32>
    %137 = arith.addf %135, %136 : vector<16x32xf32>
    %138 = vector.shape_cast %137 : vector<16x32xf32> to vector<2x8x32xf32>
    %139 = arith.addf %117, %138 : vector<2x8x32xf32>
    %cst_48 = arith.constant dense<0.000000e+00> : vector<2x8xf32>
    %140 = vector.multi_reduction <add>, %139, %cst_48 [2] : vector<2x8x32xf32> to vector<2x8xf32>
    %141 = vector.shape_cast %140 : vector<2x8xf32> to vector<2x8x1xf32>
    %cst_49 = arith.constant 3.200000e+01 : f32
    %142 = vector.broadcast %cst_49 : f32 to vector<2x8x1xf32>
    %143 = arith.divf %141, %142 : vector<2x8x1xf32>
    %144 = vector.broadcast %143 : vector<2x8x1xf32> to vector<2x8x32xf32>
    %145 = arith.subf %139, %144 : vector<2x8x32xf32>
    %146 = arith.mulf %145, %145 : vector<2x8x32xf32>
    %cst_50 = arith.constant dense<0.000000e+00> : vector<2x8xf32>
    %147 = vector.multi_reduction <add>, %146, %cst_50 [2] : vector<2x8x32xf32> to vector<2x8xf32>
    %148 = vector.shape_cast %147 : vector<2x8xf32> to vector<2x8x1xf32>
    %cst_51 = arith.constant 3.200000e+01 : f32
    %149 = vector.broadcast %cst_51 : f32 to vector<2x8x1xf32>
    %150 = arith.divf %148, %149 : vector<2x8x1xf32>
    %151 = vector.broadcast %143 : vector<2x8x1xf32> to vector<2x8x32xf32>
    %152 = arith.subf %139, %151 : vector<2x8x32xf32>
    %cst_52 = arith.constant 9.99999996E-13 : f32
    %153 = vector.broadcast %cst_52 : f32 to vector<2x8x1xf32>
    %154 = arith.addf %150, %153 : vector<2x8x1xf32>
    %155 = math.rsqrt %154 : vector<2x8x1xf32>
    %156 = vector.broadcast %155 : vector<2x8x1xf32> to vector<2x8x32xf32>
    %157 = arith.mulf %152, %156 : vector<2x8x32xf32>
    %158 = vector.shape_cast %42 : vector<1x32xf32> to vector<1x1x32xf32>
    %159 = vector.broadcast %158 : vector<1x1x32xf32> to vector<2x8x32xf32>
    %160 = arith.mulf %157, %159 : vector<2x8x32xf32>
    %161 = vector.shape_cast %43 : vector<1x32xf32> to vector<1x1x32xf32>
    %162 = vector.broadcast %161 : vector<1x1x32xf32> to vector<2x8x32xf32>
    %163 = arith.addf %160, %162 : vector<2x8x32xf32>
    %c208 = arith.constant 208 : index
    %c0_53 = arith.constant 0 : index
    %164 = vector.load %arg3[%c208, %c0_53] : memref<376x128xf32, #tpu.memory_space<vmem>>, vector<32x96xf32>
    %c368 = arith.constant 368 : index
    %c0_54 = arith.constant 0 : index
    %165 = vector.load %arg3[%c368, %c0_54] : memref<376x128xf32, #tpu.memory_space<vmem>>, vector<1x96xf32>
    %c240 = arith.constant 240 : index
    %c0_55 = arith.constant 0 : index
    %166 = vector.load %arg3[%c240, %c0_55] : memref<376x128xf32, #tpu.memory_space<vmem>>, vector<32x32xf32>
    %c369 = arith.constant 369 : index
    %c0_56 = arith.constant 0 : index
    %167 = vector.load %arg3[%c369, %c0_56] : memref<376x128xf32, #tpu.memory_space<vmem>>, vector<1x32xf32>
    %c272 = arith.constant 272 : index
    %c0_57 = arith.constant 0 : index
    %168 = vector.load %arg3[%c272, %c0_57] : memref<376x128xf32, #tpu.memory_space<vmem>>, vector<32x64xf32>
    %c370 = arith.constant 370 : index
    %c0_58 = arith.constant 0 : index
    %169 = vector.load %arg3[%c370, %c0_58] : memref<376x128xf32, #tpu.memory_space<vmem>>, vector<1x64xf32>
    %c304 = arith.constant 304 : index
    %c0_59 = arith.constant 0 : index
    %170 = vector.load %arg3[%c304, %c0_59] : memref<376x128xf32, #tpu.memory_space<vmem>>, vector<64x32xf32>
    %c371 = arith.constant 371 : index
    %c0_60 = arith.constant 0 : index
    %171 = vector.load %arg3[%c371, %c0_60] : memref<376x128xf32, #tpu.memory_space<vmem>>, vector<1x32xf32>
    %c372 = arith.constant 372 : index
    %c0_61 = arith.constant 0 : index
    %172 = vector.load %arg3[%c372, %c0_61] : memref<376x128xf32, #tpu.memory_space<vmem>>, vector<1x32xf32>
    %c373 = arith.constant 373 : index
    %c0_62 = arith.constant 0 : index
    %173 = vector.load %arg3[%c373, %c0_62] : memref<376x128xf32, #tpu.memory_space<vmem>>, vector<1x32xf32>
    %c374 = arith.constant 374 : index
    %c0_63 = arith.constant 0 : index
    %174 = vector.load %arg3[%c374, %c0_63] : memref<376x128xf32, #tpu.memory_space<vmem>>, vector<1x32xf32>
    %c375 = arith.constant 375 : index
    %c0_64 = arith.constant 0 : index
    %175 = vector.load %arg3[%c375, %c0_64] : memref<376x128xf32, #tpu.memory_space<vmem>>, vector<1x32xf32>
    %176 = vector.shape_cast %163 : vector<2x8x32xf32> to vector<16x32xf32>
    %cst_65 = arith.constant dense<0.000000e+00> : vector<16x96xf32>
    %177 = tpu.matmul %176, %164, %cst_65 {dimension_numbers = #tpu.dot_dimension_numbers<[1], [0], [0], [1], [0, 0, 1, 1], [], []>} : vector<16x32xf32>, vector<32x96xf32>, vector<16x96xf32> -> vector<16x96xf32>
    %178 = vector.broadcast %165 : vector<1x96xf32> to vector<16x96xf32>
    %179 = arith.addf %177, %178 : vector<16x96xf32>
    %180 = vector.shape_cast %179 : vector<16x96xf32> to vector<2x8x96xf32>
    %181 = vector.extract_strided_slice %180 {offsets = [0, 0, 0], sizes = [2, 8, 16], strides = [1, 1, 1]} : vector<2x8x96xf32> to vector<2x8x16xf32>
    %182 = vector.extract_strided_slice %180 {offsets = [0, 0, 32], sizes = [2, 8, 16], strides = [1, 1, 1]} : vector<2x8x96xf32> to vector<2x8x16xf32>
    %183 = vector.extract_strided_slice %180 {offsets = [0, 0, 64], sizes = [2, 8, 16], strides = [1, 1, 1]} : vector<2x8x96xf32> to vector<2x8x16xf32>
    "tpu.trace_start"() <{level = 10 : i32, message = "bqd,bkd->bqk"}> : () -> ()
    %cst_66 = arith.constant dense<0.000000e+00> : vector<2x8x8xf32>
    %184 = tpu.matmul %181, %182, %cst_66 {dimension_numbers = #tpu.dot_dimension_numbers<[2], [2], [1], [1], [0, 0, 0, 1, 1, 1], [0], [0]>} : vector<2x8x16xf32>, vector<2x8x16xf32>, vector<2x8x8xf32> -> vector<2x8x8xf32>
    "tpu.trace_stop"() : () -> ()
    %cst_67 = arith.constant 2.500000e-01 : f32
    %185 = vector.broadcast %cst_67 : f32 to vector<2x8x8xf32>
    %186 = arith.mulf %184, %185 : vector<2x8x8xf32>
    %187 = vector.broadcast %31 : vector<2x1x8xf32> to vector<2x8x8xf32>
    %188 = arith.addf %186, %187 : vector<2x8x8xf32>
    %cst_68 = arith.constant dense<0xFF800000> : vector<2x8xf32>
    %189 = vector.multi_reduction <maximumf>, %188, %cst_68 [2] : vector<2x8x8xf32> to vector<2x8xf32>
    %190 = vector.shape_cast %189 : vector<2x8xf32> to vector<2x8x1xf32>
    %191 = vector.broadcast %190 : vector<2x8x1xf32> to vector<2x8x8xf32>
    %192 = arith.subf %188, %191 : vector<2x8x8xf32>
    %193 = math.exp %192 : vector<2x8x8xf32>
    %cst_69 = arith.constant dense<0.000000e+00> : vector<2x8xf32>
    %194 = vector.multi_reduction <add>, %193, %cst_69 [2] : vector<2x8x8xf32> to vector<2x8xf32>
    %195 = vector.shape_cast %194 : vector<2x8xf32> to vector<2x8x1xf32>
    %196 = tpu.reciprocal %195 {approx = true} : vector<2x8x1xf32> -> vector<2x8x1xf32>
    %197 = vector.broadcast %196 : vector<2x8x1xf32> to vector<2x8x8xf32>
    %198 = arith.mulf %193, %197 : vector<2x8x8xf32>
    "tpu.trace_start"() <{level = 10 : i32, message = "bqk,bkd->bqd"}> : () -> ()
    %cst_70 = arith.constant dense<0.000000e+00> : vector<2x8x16xf32>
    %199 = tpu.matmul %198, %183, %cst_70 {dimension_numbers = #tpu.dot_dimension_numbers<[2], [1], [1], [2], [0, 0, 0, 1, 1, 2], [0], [0]>} : vector<2x8x8xf32>, vector<2x8x16xf32>, vector<2x8x16xf32> -> vector<2x8x16xf32>
    "tpu.trace_stop"() : () -> ()
    %200 = vector.extract_strided_slice %180 {offsets = [0, 0, 16], sizes = [2, 8, 16], strides = [1, 1, 1]} : vector<2x8x96xf32> to vector<2x8x16xf32>
    %201 = vector.extract_strided_slice %180 {offsets = [0, 0, 48], sizes = [2, 8, 16], strides = [1, 1, 1]} : vector<2x8x96xf32> to vector<2x8x16xf32>
    %202 = vector.extract_strided_slice %180 {offsets = [0, 0, 80], sizes = [2, 8, 16], strides = [1, 1, 1]} : vector<2x8x96xf32> to vector<2x8x16xf32>
    "tpu.trace_start"() <{level = 10 : i32, message = "bqd,bkd->bqk"}> : () -> ()
    %cst_71 = arith.constant dense<0.000000e+00> : vector<2x8x8xf32>
    %203 = tpu.matmul %200, %201, %cst_71 {dimension_numbers = #tpu.dot_dimension_numbers<[2], [2], [1], [1], [0, 0, 0, 1, 1, 1], [0], [0]>} : vector<2x8x16xf32>, vector<2x8x16xf32>, vector<2x8x8xf32> -> vector<2x8x8xf32>
    "tpu.trace_stop"() : () -> ()
    %cst_72 = arith.constant 2.500000e-01 : f32
    %204 = vector.broadcast %cst_72 : f32 to vector<2x8x8xf32>
    %205 = arith.mulf %203, %204 : vector<2x8x8xf32>
    %206 = vector.broadcast %31 : vector<2x1x8xf32> to vector<2x8x8xf32>
    %207 = arith.addf %205, %206 : vector<2x8x8xf32>
    %cst_73 = arith.constant dense<0xFF800000> : vector<2x8xf32>
    %208 = vector.multi_reduction <maximumf>, %207, %cst_73 [2] : vector<2x8x8xf32> to vector<2x8xf32>
    %209 = vector.shape_cast %208 : vector<2x8xf32> to vector<2x8x1xf32>
    %210 = vector.broadcast %209 : vector<2x8x1xf32> to vector<2x8x8xf32>
    %211 = arith.subf %207, %210 : vector<2x8x8xf32>
    %212 = math.exp %211 : vector<2x8x8xf32>
    %cst_74 = arith.constant dense<0.000000e+00> : vector<2x8xf32>
    %213 = vector.multi_reduction <add>, %212, %cst_74 [2] : vector<2x8x8xf32> to vector<2x8xf32>
    %214 = vector.shape_cast %213 : vector<2x8xf32> to vector<2x8x1xf32>
    %215 = tpu.reciprocal %214 {approx = true} : vector<2x8x1xf32> -> vector<2x8x1xf32>
    %216 = vector.broadcast %215 : vector<2x8x1xf32> to vector<2x8x8xf32>
    %217 = arith.mulf %212, %216 : vector<2x8x8xf32>
    "tpu.trace_start"() <{level = 10 : i32, message = "bqk,bkd->bqd"}> : () -> ()
    %cst_75 = arith.constant dense<0.000000e+00> : vector<2x8x16xf32>
    %218 = tpu.matmul %217, %202, %cst_75 {dimension_numbers = #tpu.dot_dimension_numbers<[2], [1], [1], [2], [0, 0, 0, 1, 1, 2], [0], [0]>} : vector<2x8x8xf32>, vector<2x8x16xf32>, vector<2x8x16xf32> -> vector<2x8x16xf32>
    "tpu.trace_stop"() : () -> ()
    %219 = tpu.concatenate %199, %218 in 2 : vector<2x8x16xf32>, vector<2x8x16xf32> -> vector<2x8x32xf32>
    %220 = vector.shape_cast %219 : vector<2x8x32xf32> to vector<16x32xf32>
    %cst_76 = arith.constant dense<0.000000e+00> : vector<16x32xf32>
    %221 = tpu.matmul %220, %166, %cst_76 {dimension_numbers = #tpu.dot_dimension_numbers<[1], [0], [0], [1], [0, 0, 1, 1], [], []>} : vector<16x32xf32>, vector<32x32xf32>, vector<16x32xf32> -> vector<16x32xf32>
    %222 = vector.broadcast %167 : vector<1x32xf32> to vector<16x32xf32>
    %223 = arith.addf %221, %222 : vector<16x32xf32>
    %224 = vector.shape_cast %223 : vector<16x32xf32> to vector<2x8x32xf32>
    %225 = arith.addf %163, %224 : vector<2x8x32xf32>
    %cst_77 = arith.constant dense<0.000000e+00> : vector<2x8xf32>
    %226 = vector.multi_reduction <add>, %225, %cst_77 [2] : vector<2x8x32xf32> to vector<2x8xf32>
    %227 = vector.shape_cast %226 : vector<2x8xf32> to vector<2x8x1xf32>
    %cst_78 = arith.constant 3.200000e+01 : f32
    %228 = vector.broadcast %cst_78 : f32 to vector<2x8x1xf32>
    %229 = arith.divf %227, %228 : vector<2x8x1xf32>
    %230 = vector.broadcast %229 : vector<2x8x1xf32> to vector<2x8x32xf32>
    %231 = arith.subf %225, %230 : vector<2x8x32xf32>
    %232 = arith.mulf %231, %231 : vector<2x8x32xf32>
    %cst_79 = arith.constant dense<0.000000e+00> : vector<2x8xf32>
    %233 = vector.multi_reduction <add>, %232, %cst_79 [2] : vector<2x8x32xf32> to vector<2x8xf32>
    %234 = vector.shape_cast %233 : vector<2x8xf32> to vector<2x8x1xf32>
    %cst_80 = arith.constant 3.200000e+01 : f32
    %235 = vector.broadcast %cst_80 : f32 to vector<2x8x1xf32>
    %236 = arith.divf %234, %235 : vector<2x8x1xf32>
    %237 = vector.broadcast %229 : vector<2x8x1xf32> to vector<2x8x32xf32>
    %238 = arith.subf %225, %237 : vector<2x8x32xf32>
    %cst_81 = arith.constant 9.99999996E-13 : f32
    %239 = vector.broadcast %cst_81 : f32 to vector<2x8x1xf32>
    %240 = arith.addf %236, %239 : vector<2x8x1xf32>
    %241 = math.rsqrt %240 : vector<2x8x1xf32>
    %242 = vector.broadcast %241 : vector<2x8x1xf32> to vector<2x8x32xf32>
    %243 = arith.mulf %238, %242 : vector<2x8x32xf32>
    %244 = vector.shape_cast %172 : vector<1x32xf32> to vector<1x1x32xf32>
    %245 = vector.broadcast %244 : vector<1x1x32xf32> to vector<2x8x32xf32>
    %246 = arith.mulf %243, %245 : vector<2x8x32xf32>
    %247 = vector.shape_cast %173 : vector<1x32xf32> to vector<1x1x32xf32>
    %248 = vector.broadcast %247 : vector<1x1x32xf32> to vector<2x8x32xf32>
    %249 = arith.addf %246, %248 : vector<2x8x32xf32>
    %250 = vector.shape_cast %249 : vector<2x8x32xf32> to vector<16x32xf32>
    %cst_82 = arith.constant dense<0.000000e+00> : vector<16x64xf32>
    %251 = tpu.matmul %250, %168, %cst_82 {dimension_numbers = #tpu.dot_dimension_numbers<[1], [0], [0], [1], [0, 0, 1, 1], [], []>} : vector<16x32xf32>, vector<32x64xf32>, vector<16x64xf32> -> vector<16x64xf32>
    %252 = vector.broadcast %169 : vector<1x64xf32> to vector<16x64xf32>
    %253 = arith.addf %251, %252 : vector<16x64xf32>
    %254 = arith.mulf %253, %253 : vector<16x64xf32>
    %255 = arith.mulf %253, %254 : vector<16x64xf32>
    %cst_83 = arith.constant 4.471500e-02 : f32
    %256 = vector.broadcast %cst_83 : f32 to vector<16x64xf32>
    %257 = arith.mulf %256, %255 : vector<16x64xf32>
    %258 = arith.addf %253, %257 : vector<16x64xf32>
    %cst_84 = arith.constant 0.797884583 : f32
    %259 = vector.broadcast %cst_84 : f32 to vector<16x64xf32>
    %260 = arith.mulf %259, %258 : vector<16x64xf32>
    %261 = math.tanh %260 : vector<16x64xf32>
    %cst_85 = arith.constant 1.000000e+00 : f32
    %262 = vector.broadcast %cst_85 : f32 to vector<16x64xf32>
    %263 = arith.addf %262, %261 : vector<16x64xf32>
    %cst_86 = arith.constant 5.000000e-01 : f32
    %264 = vector.broadcast %cst_86 : f32 to vector<16x64xf32>
    %265 = arith.mulf %264, %263 : vector<16x64xf32>
    %266 = arith.mulf %253, %265 : vector<16x64xf32>
    %cst_87 = arith.constant dense<0.000000e+00> : vector<16x32xf32>
    %267 = tpu.matmul %266, %170, %cst_87 {dimension_numbers = #tpu.dot_dimension_numbers<[1], [0], [0], [1], [0, 0, 1, 1], [], []>} : vector<16x64xf32>, vector<64x32xf32>, vector<16x32xf32> -> vector<16x32xf32>
    %268 = vector.broadcast %171 : vector<1x32xf32> to vector<16x32xf32>
    %269 = arith.addf %267, %268 : vector<16x32xf32>
    %270 = vector.shape_cast %269 : vector<16x32xf32> to vector<2x8x32xf32>
    %271 = arith.addf %249, %270 : vector<2x8x32xf32>
    %cst_88 = arith.constant dense<0.000000e+00> : vector<2x8xf32>
    %272 = vector.multi_reduction <add>, %271, %cst_88 [2] : vector<2x8x32xf32> to vector<2x8xf32>
    %273 = vector.shape_cast %272 : vector<2x8xf32> to vector<2x8x1xf32>
    %cst_89 = arith.constant 3.200000e+01 : f32
    %274 = vector.broadcast %cst_89 : f32 to vector<2x8x1xf32>
    %275 = arith.divf %273, %274 : vector<2x8x1xf32>
    %276 = vector.broadcast %275 : vector<2x8x1xf32> to vector<2x8x32xf32>
    %277 = arith.subf %271, %276 : vector<2x8x32xf32>
    %278 = arith.mulf %277, %277 : vector<2x8x32xf32>
    %cst_90 = arith.constant dense<0.000000e+00> : vector<2x8xf32>
    %279 = vector.multi_reduction <add>, %278, %cst_90 [2] : vector<2x8x32xf32> to vector<2x8xf32>
    %280 = vector.shape_cast %279 : vector<2x8xf32> to vector<2x8x1xf32>
    %cst_91 = arith.constant 3.200000e+01 : f32
    %281 = vector.broadcast %cst_91 : f32 to vector<2x8x1xf32>
    %282 = arith.divf %280, %281 : vector<2x8x1xf32>
    %283 = vector.broadcast %275 : vector<2x8x1xf32> to vector<2x8x32xf32>
    %284 = arith.subf %271, %283 : vector<2x8x32xf32>
    %cst_92 = arith.constant 9.99999996E-13 : f32
    %285 = vector.broadcast %cst_92 : f32 to vector<2x8x1xf32>
    %286 = arith.addf %282, %285 : vector<2x8x1xf32>
    %287 = math.rsqrt %286 : vector<2x8x1xf32>
    %288 = vector.broadcast %287 : vector<2x8x1xf32> to vector<2x8x32xf32>
    %289 = arith.mulf %284, %288 : vector<2x8x32xf32>
    %290 = vector.shape_cast %174 : vector<1x32xf32> to vector<1x1x32xf32>
    %291 = vector.broadcast %290 : vector<1x1x32xf32> to vector<2x8x32xf32>
    %292 = arith.mulf %289, %291 : vector<2x8x32xf32>
    %293 = vector.shape_cast %175 : vector<1x32xf32> to vector<1x1x32xf32>
    %294 = vector.broadcast %293 : vector<1x1x32xf32> to vector<2x8x32xf32>
    %295 = arith.addf %292, %294 : vector<2x8x32xf32>
    %c0_93 = arith.constant 0 : index
    %c0_94 = arith.constant 0 : index
    %296 = vector.load %arg3[%c0_93, %c0_94] : memref<376x128xf32, #tpu.memory_space<vmem>>, vector<32x128xf32>
    %c32 = arith.constant 32 : index
    %c0_95 = arith.constant 0 : index
    %297 = vector.load %arg3[%c32, %c0_95] : memref<376x128xf32, #tpu.memory_space<vmem>>, vector<1x128xf32>
    %298 = vector.shape_cast %295 : vector<2x8x32xf32> to vector<16x32xf32>
    %cst_96 = arith.constant dense<0.000000e+00> : vector<16x128xf32>
    %299 = tpu.matmul %298, %296, %cst_96 {dimension_numbers = #tpu.dot_dimension_numbers<[1], [0], [0], [1], [0, 0, 1, 1], [], []>} : vector<16x32xf32>, vector<32x128xf32>, vector<16x128xf32> -> vector<16x128xf32>
    %300 = vector.broadcast %297 : vector<1x128xf32> to vector<16x128xf32>
    %301 = arith.addf %299, %300 : vector<16x128xf32>
    %302 = vector.shape_cast %301 : vector<16x128xf32> to vector<2x8x128xf32>
    %c0_97 = arith.constant 0 : index
    %c0_98 = arith.constant 0 : index
    %c0_99 = arith.constant 0 : index
    %303 = vector.load %arg4[%c0_97, %c0_98, %c0_99] : memref<2x8x128xf32, #tpu.memory_space<vmem>>, vector<2x8x128xf32>
    tpu.vector_store %arg4[%c0_97, %c0_98, %c0_99], %302 {strides = array<i32>} : memref<2x8x128xf32, #tpu.memory_space<vmem>>, vector<2x8x128xf32>,
    %c0_100 = arith.constant 0 : index
    %c0_101 = arith.constant 0 : index
    %c0_102 = arith.constant 0 : index
    %304 = vector.load %arg2[%c0_100, %c0_101, %c0_102] : memref<2x8x1xi32, #tpu.memory_space<vmem>>, vector<2x8x1xi32>
    %305 = tpu.iota {dimensions = array<i32: 2>} : vector<2x8x128xi32>
    %c5_i32 = arith.constant 5 : i32
    %306 = vector.broadcast %c5_i32 : i32 to vector<2x8x128xi32>
    %307 = arith.cmpi slt, %305, %306 : vector<2x8x128xi32>
    %cst_103 = arith.constant -1.000000e+09 : f32
    %308 = vector.broadcast %cst_103 : f32 to vector<2x8x128xf32>
    %309 = arith.select %307, %302, %308 : vector<2x8x128xi1>, vector<2x8x128xf32>
    %cst_104 = arith.constant dense<0xFF800000> : vector<2x8xf32>
    %310 = vector.multi_reduction <maximumf>, %309, %cst_104 [2] : vector<2x8x128xf32> to vector<2x8xf32>
    %311 = vector.shape_cast %310 : vector<2x8xf32> to vector<2x8x1xf32>
    %312 = vector.broadcast %311 : vector<2x8x1xf32> to vector<2x8x128xf32>
    %313 = arith.subf %309, %312 : vector<2x8x128xf32>
    %314 = math.exp %313 : vector<2x8x128xf32>
    %cst_105 = arith.constant dense<0.000000e+00> : vector<2x8xf32>
    %315 = vector.multi_reduction <add>, %314, %cst_105 [2] : vector<2x8x128xf32> to vector<2x8xf32>
    %316 = vector.shape_cast %315 : vector<2x8xf32> to vector<2x8x1xf32>
    %317 = math.log %316 : vector<2x8x1xf32>
    %318 = vector.broadcast %311 : vector<2x8x1xf32> to vector<2x8x128xf32>
    %319 = arith.subf %309, %318 : vector<2x8x128xf32>
    %320 = vector.broadcast %317 : vector<2x8x1xf32> to vector<2x8x128xf32>
    %321 = arith.subf %319, %320 : vector<2x8x128xf32>
    %322 = vector.broadcast %304 : vector<2x8x1xi32> to vector<2x8x128xi32>
    %323 = arith.cmpi eq, %305, %322 : vector<2x8x128xi32>
    %cst_106 = arith.constant 0.000000e+00 : f32
    %324 = vector.broadcast %cst_106 : f32 to vector<2x8x128xf32>
    %325 = arith.select %323, %321, %324 : vector<2x8x128xi1>, vector<2x8x128xf32>
    %cst_107 = arith.constant dense<0.000000e+00> : vector<2x8xf32>
    %326 = vector.multi_reduction <add>, %325, %cst_107 [2] : vector<2x8x128xf32> to vector<2x8xf32>
    %327 = vector.shape_cast %326 : vector<2x8xf32> to vector<2x8x1xf32>
    %cst_108 = arith.constant 0.000000e+00 : f32
    %328 = vector.broadcast %cst_108 : f32 to vector<2x8x1xf32>
    %329 = arith.subf %328, %327 : vector<2x8x1xf32>
    %c-100_i32 = arith.constant -100 : i32
    %330 = vector.broadcast %c-100_i32 : i32 to vector<2x8x1xi32>
    %331 = arith.cmpi ne, %304, %330 : vector<2x8x1xi32>
    %332 = arith.extui %331 : vector<2x8x1xi1> to vector<2x8x1xi32>
    %333 = arith.sitofp %332 : vector<2x8x1xi32> to vector<2x8x1xf32>
    %cst_109 = arith.constant dense<0.000000e+00> : vector<2x1xf32>
    %334 = vector.multi_reduction <add>, %329, %cst_109 [1] : vector<2x8x1xf32> to vector<2x1xf32>
    %335 = vector.shape_cast %334 : vector<2x1xf32> to vector<2x1x1xf32>
    %cst_110 = arith.constant dense<0.000000e+00> : vector<2x1xf32>
    %336 = vector.multi_reduction <add>, %333, %cst_110 [1] : vector<2x8x1xf32> to vector<2x1xf32>
    %337 = vector.shape_cast %336 : vector<2x1xf32> to vector<2x1x1xf32>
    %338 = tpu.iota {dimensions = array<i32: 2>} : vector<2x1x128xi32>
    %c0_i32 = arith.constant 0 : i32
    %339 = vector.broadcast %c0_i32 : i32 to vector<2x1x128xi32>
    %340 = arith.cmpi eq, %338, %339 : vector<2x1x128xi32>
    %c1_i32 = arith.constant 1 : i32
    %341 = vector.broadcast %c1_i32 : i32 to vector<2x1x128xi32>
    %342 = arith.cmpi eq, %338, %341 : vector<2x1x128xi32>
    %cst_111 = arith.constant 0.000000e+00 : f32
    %343 = vector.shape_cast %337 : vector<2x1x1xf32> to vector<2x1x1xf32>
    %344 = vector.broadcast %343 : vector<2x1x1xf32> to vector<2x1x128xf32>
    %345 = vector.broadcast %cst_111 : f32 to vector<2x1x128xf32>
    %346 = arith.select %342, %344, %345 : vector<2x1x128xi1>, vector<2x1x128xf32>
    %347 = vector.shape_cast %335 : vector<2x1x1xf32> to vector<2x1x1xf32>
    %348 = vector.broadcast %347 : vector<2x1x1xf32> to vector<2x1x128xf32>
    %349 = arith.select %340, %348, %346 : vector<2x1x128xi1>, vector<2x1x128xf32>
    %c0_112 = arith.constant 0 : index
    %c0_113 = arith.constant 0 : index
    %c0_114 = arith.constant 0 : index
    %350 = vector.load %arg5[%c0_112, %c0_113, %c0_114] : memref<2x1x128xf32, #tpu.memory_space<vmem>>, vector<2x1x128xf32>
    tpu.vector_store %arg5[%c0_112, %c0_113, %c0_114], %349 {strides = array<i32>} : memref<2x1x128xf32, #tpu.memory_space<vmem>>, vector<2x1x128xf32>,
    return
  }
}

</mosaic_0001>

<bundles_post_ra>
// kernel: _forward_impl.1
= control target key start
LH: loop header
LB: loop body
LE: loop exit
PB: predicated region body
PF: predicated region fallthrough
CT: control target
= control target key end

     0   :  { %11 = vsyncpa [#allocation3], 0  ;;  %s3033_s18 = smov [#allocation2]   ;;  %s3352_s0 = inlined_call_operand.vmem [shape: f32[2,8,32], index: 0, kind: input, shape index: {}]   ;;  %s3353_s1 = inlined_call_operand.vmem [shape: f32[2,1,8], index: 1, kind: input, shape index: {}]   ;;  %s3354_s2 = inlined_call_operand.vmem [shape: s32[2,8,1], index: 2, kind: input, shape index: {}]   ;;  %s3355_s3 = inlined_call_operand.hbm [shape: f32[376,128], index: 3, kind: input, shape index: {}]   ;;  %s3356_s4 = inlined_call_operand.vmem [shape: f32[2,8,128], index: 4, kind: output, shape index: {0}]   ;;  %s3357_s5 = inlined_call_operand.vmem [shape: f32[2,1,128], index: 5, kind: output, shape index: {1}]  }
   0x1   :  { %s23_s19 = sshll.u32 %s3033_s18, 4  ;;  %s24_s19 = int_to_ptr.vmem [resolvable:$true] %s23_s19 }
   0x2   :  { %s3019_s20 = scalar_lea.vmem %s24_s19, 6016  ;;  %p3024_p1 = scmp.lt.s32.totalorder %s24_s19, %s24_s19 }
   0x3   :  { %p3020_p0 = scmp.ne.s32.totalorder %s24_s19, %s3019_s20  ;;  %p3025_p2 = scmp.lt.s32.totalorder %s3019_s20, %s3019_s20 }
   0x5   :  { %p3026_p3 = por %p3025_p2, %p3024_p1 }
   0x7   :  { %p3027_p4 = pnand %p3026_p3, %p3020_p0 }
   0x9   :  { %3030 = shalt.err (!%p3027_p4)
}
   0xa   :  { %s3034_s21 = smov 128   ;;  %s3035_s22 = smov 8  }
   0xb   :  { %29 = dma.hbm_to_vmem [thread:$0]  %s3355_s3, 6016, %s24_s19, [#allocation3], %s3034_s21, %s3034_s21, %s3035_s22  }
   0xc   :  { %3031 = dma.done.wait [#allocation3], 6016  }
   0xd   :  { %3032 = vsyncadd [#allocation3], 4294961280  ;;  %vm37_vm0 = vcmask 261120   ;;  %v33_v0 = vld [vmem:[%s3352_s0] sm:$0xff]  ;;  %v34_v1 = vld [vmem:[%s3352_s0 + $0x8] sm:$0xff]  ;;  %v3036_v34 = vmov 0.0   ;;  %v355_v42 = vlaneseq }
   0xe   :  { %v38_v2 = vsel %vm37_vm0, %v33_v0, 0.0  ;;  %v41_v3 = vsel %vm37_vm0, %v34_v1, 0.0  ;;  %v86_v14 = vld [vmem:[#allocation2 + $0x40] sm:$0xff]  ;;  %v85_v15 = vld [vmem:[#allocation2 + $0x38] sm:$0xff]  ;;  %v84_v16 = vld [vmem:[#allocation2 + $0x30] sm:$0xff]  ;;  %2745 = vmatprep.subr.mxu1 %v3036_v34  ;;  %vm3037_vm1 = vmmov 0  }
   0xf   :  { %39 = vadd.xlane.f32.xlu0 %v38_v2  ;;  %2734 = vmatprep.subr.mxu0 %v86_v14  ;;  %v83_v17 = vld [vmem:[#allocation2 + $0x28] sm:$0xff]  ;;  %v2577_v25 = vld [vmem:[#allocation2 + $0x21] ss:$0 sm:$0xff]  ;;  %v2578_v27 = vld [vmem:[#allocation2 + $0x22] ss:$0 sm:$0xff]  ;;  %s3038_s0 = smov 96  }
  0x10   :  { %2735 = vmatpush3.msra.mxu0 %v86_v14  ;;  %2747 = vmatprep.mubr.msk.f32.mxu1 %vm3037_vm1, %v3036_v34  ;;  %v2579_v35 = vld [vmem:[#allocation2 + $0xc8] ss:$0 sm:$0xff]  ;;  %vm199_vm2 = vcmask 130048   ;;  %v77_v43 = vld [vmem:[%s3353_s1] sm:$0x1]  ;;  %v356_v45 = vshrl.u32 %v355_v42, 7 }
  0x11   :  { %2736 = vmatprep.subr.mxu0 %v85_v15  ;;  %v79_v44 = vsub.f32 1.0, %v77_v43  ;;  %v78_v46 = vld [vmem:[%s3353_s1 + $0x1] sm:$0x1]  ;;  %vm367_vm3 = vcmask 64512   ;;  %s3039_s1 = smov 64   ;;  %s3040_s7 = smov 80  }
  0x12   :  { %2737 = vmatpush3.msra.mxu0 %v85_v15  ;;  %v357_v48 = vsub.s32 0, %v356_v45  ;;  %v80_v49 = vsub.f32 1.0, %v78_v46  ;;  %s3041_s8 = smov 112   ;;  %s3042_s9 = smov 48   ;;  %vm1118_vm4 = vcmask 523264   ;;  %vm2535_vm7 = vcmask 7168  }
  0x13   :  { %42 = vadd.xlane.f32.xlu0 %v41_v3  ;;  %2738 = vmatprep.subr.mxu0 %v84_v16  ;;  %v81_v47 = vmul.f32 -1e+09, %v79_v44  ;;  %s3043_s10 = smov 16  }
  0x14   :  { %2739 = vmatpush3.msra.mxu0 %v84_v16  ;;  %v82_v51 = vmul.f32 -1e+09, %v80_v49 }
  0x15   :  { %2740 = vmatprep.subr.mxu0 %v83_v17  ;;  %v3129_v50 = vrot.slane %v81_v47, %v357_v48 }
  0x16   :  { %2741 = vmatpush3.msra.mxu0 %v83_v17  ;;  %v3132_v56 = vrot.slane %v82_v51, %v357_v48 }
  0x17   :  { %2765 = vmatprep.subr.mxu0 %v3036_v34 }
  0x98   :  { %v40_v4 = vpop.xlane.xlu0 %39 }
  0x99   :  { %v45_v5 = vmul.f32 0.03125, %v40_v4 }
  0x9b   :  { %v47_v6 = vsub.f32 %v33_v0, %v45_v5 }
  0x9c   :  { %v43_v7 = vpop.xlane.xlu0 %42 }
  0x9d   :  { %v46_v8 = vmul.f32 0.03125, %v43_v7  ;;  %v49_v9 = vmul.f32 %v47_v6, %v47_v6 }
  0x9f   :  { %v48_v10 = vsub.f32 %v34_v1, %v46_v8  ;;  %v51_v11 = vsel %vm37_vm0, %v49_v9, 0.0 }
  0xa0   :  { %52 = vadd.xlane.f32.xlu1 %v51_v11 }
  0xa1   :  { %v50_v12 = vmul.f32 %v48_v10, %v48_v10 }
  0xa3   :  { %v54_v13 = vsel %vm37_vm0, %v50_v12, 0.0 }
  0xa4   :  { %55 = vadd.xlane.f32.xlu1 %v54_v13 }
 0x129   :  { %v53_v18 = vpop.xlane.xlu1 %52 }
 0x12a   :  { %v57_v19 = vmul.f32 0.03125, %v53_v18 }
 0x12c   :  { %v59_v20 = vadd.f32 1e-12, %v57_v19 }
 0x12d   :  { %v56_v21 = vpop.xlane.xlu1 %55 }
 0x12e   :  { %2943 = vrsqrt.f32 %v59_v20  ;;  %v58_v22 = vmul.f32 0.03125, %v56_v21 }
 0x130   :  { %v60_v23 = vadd.f32 1e-12, %v58_v22 }
 0x132   :  { %2945 = vrsqrt.f32 %v60_v23 }
 0x13b   :  { %v2944_v24 = vpop.eup %2943 }
 0x13c   :  { %v63_v26 = vmul.f32 %v2944_v24, %v47_v6 }
 0x13e   :  { %v69_v28 = vmul.f32 %v2577_v25, %v63_v26 }
 0x13f   :  { %v2946_v29 = vpop.eup %2945 }
 0x140   :  { %v64_v30 = vmul.f32 %v2946_v29, %v48_v10  ;;  %v3088_v31 = vadd.f32 %v2578_v27, %v69_v28 }
 0x142   :  { %v70_v32 = vmul.f32 %v2577_v25, %v64_v30  ;;  %2742 = vmatprep.mubr.msk.f32.mxu0 %vm37_vm0, %v3088_v31 }
 0x144   :  { %v3092_v33 = vadd.f32 %v2578_v27, %v70_v32 }
 0x146   :  { %2743 = vmatmul.mubr.msk.f32.vlgmr.msra.gmra.mxu0 %vm37_vm0, %v3092_v33 }
 0x147   :  { %2767 = vmatprep.mubr.msk.f32.mxu0 %vm3037_vm1, %v3036_v34 }
 0x206   :  { %v2744_v36 = vpop.f32.mrf.mxu0 }
 0x207   :  { %v3102_v37 = vadd.f32 %v2744_v36, %v2579_v35 }
 0x208   :  { %v187_v38 = vpop.f32.mrf.mxu0 }
 0x209   :  { %v3104_v39 = vadd.f32 %v2579_v35, %v187_v38  ;;  %275 = vrot.lane.b32.xlu1 %v3102_v37, %s3038_s0 }
 0x20b   :  { %197 = vrot.lane.b32.xlu0 %v3104_v39, %s3038_s0 }
 0x27b   :  { %v276_v41 = vpop.permute.xlu1 %275 }
 0x27d   :  { %v198_v40 = vpop.permute.xlu0 %197 }
 0x27e   :  { %2746 = vmatpush3.xpose.msk.msra.mxu1 %vm199_vm2, %v198_v40 }
 0x27f   :  { %2750 = vmatprep.subr.mxu1 %v3036_v34 }
 0x281   :  { %2748 = vmatmul.mubr.msk.f32.vlgmr.msra.gmra.mxu1 %vm199_vm2, %v3104_v39 }
 0x282   :  { %2751 = vmatpush3.xpose.msk.msra.mxu1 %vm199_vm2, %v276_v41  ;;  %2752 = vmatprep.mubr.msk.f32.mxu1 %vm3037_vm1, %v3036_v34 }
 0x283   :  { %2755 = vmatprep.subr.mxu1 %v3036_v34 }
 0x285   :  { %2753 = vmatmul.mubr.msk.f32.vlgmr.msra.gmra.mxu1 %vm199_vm2, %v3102_v37 }
 0x286   :  { %2757 = vmatprep.mubr.msk.f32.mxu1 %vm3037_vm1, %v3036_v34 }
 0x341   :  { %v270_v52 = vpop.f32.mrf.mxu1 }
 0x342   :  { %v351_v53 = vmul.f32 0.25, %v270_v52 }
 0x343   :  { %v2749_v54 = vpop.f32.mrf.mxu1 }
 0x344   :  { %v365_v55 = vadd.f32 %v3129_v50, %v351_v53 }
 0x345   :  { %v347_v57 = vpop.f32.mrf.mxu1 }
 0x346   :  { %v352_v58 = vmul.f32 0.25, %v347_v57  ;;  %v368_v59 = vsel %vm367_vm3, %v365_v55, -inf }
 0x347   :  { %369 = vmax.xlane.f32.xlu1 %v368_v59  ;;  %v2754_v60 = vpop.f32.mrf.mxu1 }
 0x348   :  { %v366_v61 = vadd.f32 %v3132_v56, %v352_v58  ;;  %v91_v60 = vld [vmem:[#allocation2 + $0x60] sm:$0xff] }
 0x34a   :  { %v371_v62 = vsel %vm367_vm3, %v366_v61, -inf }
 0x34b   :  { %372 = vmax.xlane.f32.xlu0 %v371_v62  ;;  %v89_v62 = vld [vmem:[#allocation2 + $0x50] sm:$0xff] }
 0x358   :  { %466 = vrot.lane.b32.xlu1 %v3102_v37, %s3039_s1 }
 0x35c   :  { %544 = vrot.lane.b32.xlu1 %v3104_v39, %s3040_s7 }
 0x360   :  { %622 = vrot.lane.b32.xlu1 %v3102_v37, %s3040_s7 }
 0x3d0   :  { %v370_v63 = vpop.xlane.xlu1 %369 }
 0x3d1   :  { %v374_v0 = vsub.f32 %v365_v55, %v370_v63 }
 0x3d3   :  { %v376_v1 = vmul.f32 1.442695, %v374_v0 }
 0x3d4   :  { %v467_v2 = vpop.permute.xlu1 %466  ;;  %v373_v3 = vpop.xlane.xlu0 %372 }
 0x3d5   :  { %2947 = vpow2.f32 %v376_v1  ;;  %v375_v4 = vsub.f32 %v366_v61, %v373_v3  ;;  %v90_v61 = vld [vmem:[#allocation2 + $0x58] sm:$0xff] }
 0x3d7   :  { %v378_v5 = vmul.f32 1.442695, %v375_v4 }
 0x3d8   :  { %v545_v6 = vpop.permute.xlu1 %544 }
 0x3d9   :  { %2949 = vpow2.f32 %v378_v5  ;;  %2766 = vmatpush3.xpose.msk.msra.mxu0 %vm199_vm2, %v545_v6 }
 0x3da   :  { %2775 = vmatprep.subr.mxu0 %v3036_v34 }
 0x3dc   :  { %v623_v11 = vpop.permute.xlu1 %622 }
 0x3e2   :  { %v2948_v7 = vpop.eup %2947 }
 0x3e3   :  { %v380_v8 = vsel %vm367_vm3, %v2948_v7, 0.0 }
 0x3e4   :  { %381 = vadd.xlane.f32.xlu0 %v380_v8 }
 0x3e6   :  { %v2950_v9 = vpop.eup %2949 }
 0x3e7   :  { %v383_v10 = vsel %vm367_vm3, %v2950_v9, 0.0 }
 0x3e8   :  { %384 = vadd.xlane.f32.xlu1 %v383_v10 }
 0x3f9   :  { %620 = vrot.lane.b32.xlu1 %v3102_v37, %s3041_s8 }
 0x3fa   :  { %390 = vrot.lane.b32.xlu0 %v3104_v39, %s3039_s1 }
 0x3fe   :  { %542 = vrot.lane.b32.xlu0 %v3104_v39, %s3041_s8 }
 0x46d   :  { %v382_v12 = vpop.xlane.xlu0 %381 }
 0x46e   :  { %2951 = vrcp.f32 %v382_v12 }
 0x471   :  { %v385_v13 = vpop.xlane.xlu1 %384  ;;  %v391_v14 = vpop.permute.xlu0 %390 }
 0x472   :  { %2953 = vrcp.f32 %v385_v13  ;;  %2756 = vmatpush3.msra.mxu1 %v391_v14 }
 0x473   :  { %2760 = vmatprep.subr.mxu1 %v3036_v34 }
 0x475   :  { %v543_v15 = vpop.permute.xlu0 %542  ;;  %v621_v20 = vpop.permute.xlu1 %620 }
 0x476   :  { %2768 = vmatmul.mubr.msk.f32.vlgmr.msra.gmra.mxu0 %vm199_vm2, %v543_v15 }
 0x477   :  { %2777 = vmatprep.mubr.msk.f32.mxu0 %vm3037_vm1, %v3036_v34 }
 0x47b   :  { %v2952_v16 = vpop.eup %2951 }
 0x47c   :  { %v388_v17 = vmul.f32 %v2952_v16, %v2948_v7  ;;  %v2594_v7 = vld [vmem:[#allocation2 + $0xc9] ss:$0 sm:$0xff] }
 0x47e   :  { %2758 = vmatmul.mubr.msk.f32.vlgmr.msra.gmra.mxu1 %vm367_vm3, %v388_v17 }
 0x47f   :  { %v2954_v18 = vpop.eup %2953  ;;  %2761 = vmatpush3.msra.mxu1 %v467_v2  ;;  %2762 = vmatprep.mubr.msk.f32.mxu1 %vm3037_vm1, %v3036_v34 }
 0x480   :  { %2770 = vmatprep.subr.mxu1 %v3036_v34  ;;  %v389_v19 = vmul.f32 %v2954_v18, %v2950_v9 }
 0x482   :  { %2763 = vmatmul.mubr.msk.f32.vlgmr.msra.gmra.mxu1 %vm367_vm3, %v389_v19 }
 0x483   :  { %2771 = vmatpush3.xpose.msk.msra.mxu1 %vm199_vm2, %v623_v11  ;;  %2772 = vmatprep.mubr.msk.f32.mxu1 %vm3037_vm1, %v3036_v34 }
 0x484   :  { %2780 = vmatprep.subr.mxu1 %v3036_v34 }
 0x486   :  { %2773 = vmatmul.mubr.msk.f32.vlgmr.msra.gmra.mxu1 %vm199_vm2, %v621_v20 }
 0x487   :  { %2782 = vmatprep.mubr.msk.f32.mxu1 %vm3037_vm1, %v3036_v34 }
 0x536   :  { %v616_v21 = vpop.f32.mrf.mxu0 }
 0x537   :  { %v698_v22 = vmul.f32 0.25, %v616_v21 }
 0x538   :  { %v2769_v23 = vpop.f32.mrf.mxu0 }
 0x539   :  { %v700_v24 = vadd.f32 %v698_v22, %v3129_v50 }
 0x53b   :  { %v702_v25 = vsel %vm367_vm3, %v700_v24, -inf }
 0x53c   :  { %703 = vmax.xlane.f32.xlu0 %v702_v25  ;;  %v96_v25 = vld [vmem:[#allocation2 + $0x80] sm:$0xff] }
 0x53e   :  { %v462_v26 = vpop.f32.mrf.mxu1 }
 0x540   :  { %v2759_v27 = vpop.f32.mrf.mxu1 }
 0x541   :  { %v93_v27 = vld [vmem:[#allocation2 + $0x68] sm:$0xff] }
 0x542   :  { %v3171_v28 = vpop.f32.mrf.mxu1 }
 0x544   :  { %v2764_v29 = vpop.f32.mrf.mxu1 }
 0x546   :  { %v694_v30 = vpop.f32.mrf.mxu1 }
 0x547   :  { %v699_v32 = vmul.f32 0.25, %v694_v30 }
 0x548   :  { %v2774_v35 = vpop.f32.mrf.mxu1 }
 0x549   :  { %v701_v36 = vadd.f32 %v699_v32, %v3132_v56 }
 0x54b   :  { %v705_v38 = vsel %vm367_vm3, %v701_v36, -inf }
 0x54c   :  { %706 = vmax.xlane.f32.xlu1 %v705_v38 }
 0x55d   :  { %800 = vrot.lane.b32.xlu1 %v3102_v37, %s3042_s9 }
 0x5c5   :  { %v704_v40 = vpop.xlane.xlu0 %703 }
 0x5c6   :  { %v708_v41 = vsub.f32 %v700_v24, %v704_v40  ;;  %v2597_v40 = vld [vmem:[#allocation2 + $0xcc] ss:$0 sm:$0xff] }
 0x5c8   :  { %v710_v43 = vmul.f32 1.442695, %v708_v41 }
 0x5ca   :  { %2955 = vpow2.f32 %v710_v43  ;;  %v2598_v43 = vld [vmem:[#allocation2 + $0xcd] ss:$0 sm:$0xff] }
 0x5d5   :  { %v707_v44 = vpop.xlane.xlu1 %706 }
 0x5d6   :  { %v709_v45 = vsub.f32 %v701_v36, %v707_v44 }
 0x5d7   :  { %v2956_v46 = vpop.eup %2955 }
 0x5d8   :  { %v712_v47 = vmul.f32 1.442695, %v709_v45  ;;  %v714_v48 = vsel %vm367_vm3, %v2956_v46, 0.0 }
 0x5d9   :  { %715 = vadd.xlane.f32.xlu0 %v714_v48  ;;  %v801_v49 = vpop.permute.xlu1 %800 }
 0x5da   :  { %2957 = vpow2.f32 %v712_v47  ;;  %2781 = vmatpush3.msra.mxu1 %v801_v49 }
 0x5db   :  { %2796 = vmatprep.subr.mxu1 %v96_v25 }
 0x5e7   :  { %v2958_v51 = vpop.eup %2957 }
 0x5e8   :  { %v717_v52 = vsel %vm367_vm3, %v2958_v51, 0.0 }
 0x5e9   :  { %718 = vadd.xlane.f32.xlu0 %v717_v52  ;;  %v104_v52 = vld [vmem:[#allocation2 + $0xb8] sm:$0xff] }
 0x5ff   :  { %724 = vrot.lane.b32.xlu0 %v3104_v39, %s3042_s9  ;;  %v88_v39 = vld [vmem:[#allocation2 + $0x48] sm:$0xff] }
 0x662   :  { %v716_v37 = vpop.xlane.xlu0 %715 }
 0x663   :  { %2959 = vrcp.f32 %v716_v37  ;;  %v103_v37 = vld [vmem:[#allocation2 + $0xb0] sm:$0xff] }
 0x670   :  { %v2960_v54 = vpop.eup %2959 }
 0x671   :  { %v722_v57 = vmul.f32 %v2960_v54, %v2956_v46  ;;  %v101_v54 = vld [vmem:[#allocation2 + $0xa0] sm:$0xff] }
 0x672   :  { %v719_v53 = vpop.xlane.xlu0 %718 }
 0x673   :  { %2961 = vrcp.f32 %v719_v53  ;;  %v102_v53 = vld [vmem:[#allocation2 + $0xa8] sm:$0xff] }
 0x676   :  { %v725_v55 = vpop.permute.xlu0 %724 }
 0x677   :  { %2776 = vmatpush3.msra.mxu0 %v725_v55  ;;  %v100_v55 = vld [vmem:[#allocation2 + $0x98] sm:$0xff] }
 0x678   :  { %2778 = vmatmul.mubr.msk.f32.vlgmr.msra.gmra.mxu0 %vm367_vm3, %v722_v57  ;;  %2785 = vmatprep.subr.mxu0 %v91_v60  ;;  %v99_v57 = vld [vmem:[#allocation2 + $0x90] sm:$0xff] }
 0x679   :  { %2786 = vmatpush3.msra.mxu0 %v91_v60 }
 0x67a   :  { %2787 = vmatprep.subr.mxu0 %v90_v61 }
 0x67b   :  { %2788 = vmatpush3.msra.mxu0 %v90_v61 }
 0x67c   :  { %2789 = vmatprep.subr.mxu0 %v89_v62 }
 0x67d   :  { %2790 = vmatpush3.msra.mxu0 %v89_v62 }
 0x67e   :  { %2791 = vmatprep.subr.mxu0 %v88_v39 }
 0x67f   :  { %2792 = vmatpush3.msra.mxu0 %v88_v39 }
 0x680   :  { %v2962_v58 = vpop.eup %2961 }
 0x681   :  { %v723_v59 = vmul.f32 %v2962_v58, %v2958_v51  ;;  %v105_v51 = vld [vmem:[#allocation2 + $0xc0] sm:$0xff]  ;;  %v98_v58 = vld [vmem:[#allocation2 + $0x88] sm:$0xff] }
 0x682   :  { %2807 = vmatprep.subr.mxu0 %v105_v51 }
 0x683   :  { %2783 = vmatmul.mubr.msk.f32.vlgmr.msra.gmra.mxu1 %vm367_vm3, %v723_v59  ;;  %v2599_v59 = vld [vmem:[#allocation2 + $0xca] ss:$0 sm:$0xff] }
 0x684   :  { %2797 = vmatpush3.msra.mxu1 %v96_v25 }
 0x738   :  { %v796_v63 = vpop.f32.mrf.mxu0 }
 0x739   :  { %878 = vrot.lane.b32.xlu1 %v796_v63, %s3043_s10 }
 0x73a   :  { %v2779_v0 = vpop.f32.mrf.mxu0 }
 0x743   :  { %v872_v1 = vpop.f32.mrf.mxu1 }
 0x744   :  { %880 = vrot.lane.b32.xlu1 %v872_v1, %s3043_s10 }
 0x745   :  { %v2784_v2 = vpop.f32.mrf.mxu1 }
 0x7ab   :  { %v879_v3 = vpop.permute.xlu1 %878 }
 0x7ac   :  { %v884_v4 = vsel %vm199_vm2, %v462_v26, %v879_v3  ;;  %v94_v26 = vld [vmem:[#allocation2 + $0x70] sm:$0xff] }
 0x7ad   :  { %2793 = vmatprep.mubr.msk.f32.mxu0 %vm37_vm0, %v884_v4 }
 0x7b6   :  { %v881_v5 = vpop.permute.xlu1 %880 }
 0x7b7   :  { %v885_v6 = vsel %vm199_vm2, %v3171_v28, %v881_v5 }
 0x7b8   :  { %2794 = vmatmul.mubr.msk.f32.vlgmr.msra.gmra.mxu0 %vm37_vm0, %v885_v6 }
 0x7b9   :  { %2808 = vmatpush3.msra.mxu0 %v105_v51 }
 0x7ba   :  { %2809 = vmatprep.subr.mxu0 %v104_v52 }
 0x7bb   :  { %2810 = vmatpush3.msra.mxu0 %v104_v52  ;;  %v2605_v52 = vld [vmem:[#allocation2 + $0xce] ss:$0 sm:$0xff] }
 0x7bc   :  { %2811 = vmatprep.subr.mxu0 %v103_v37 }
 0x7bd   :  { %2812 = vmatpush3.msra.mxu0 %v103_v37 }
 0x7be   :  { %2813 = vmatprep.subr.mxu0 %v102_v53 }
 0x7bf   :  { %2814 = vmatpush3.msra.mxu0 %v102_v53 }
 0x7c0   :  { %2815 = vmatprep.subr.mxu0 %v101_v54 }
 0x7c1   :  { %2816 = vmatpush3.msra.mxu0 %v101_v54 }
 0x7c2   :  { %2817 = vmatprep.subr.mxu0 %v100_v55 }
 0x7c3   :  { %2818 = vmatpush3.msra.mxu0 %v100_v55 }
 0x7c4   :  { %2819 = vmatprep.subr.mxu0 %v99_v57 }
 0x7c5   :  { %2820 = vmatpush3.msra.mxu0 %v99_v57  ;;  %v2606_v57 = vld [vmem:[#allocation2 + $0xcf] ss:$0 sm:$0xff] }
 0x7c6   :  { %2821 = vmatprep.subr.mxu0 %v98_v58 }
 0x7c7   :  { %2822 = vmatpush3.msra.mxu0 %v98_v58 }
 0x7c8   :  { %2847 = vmatprep.subr.mxu0 %v3036_v34 }
 0x878   :  { %v2795_v8 = vpop.f32.mrf.mxu0 }
 0x879   :  { %v968_v9 = vadd.f32 %v2795_v8, %v2594_v7 }
 0x87a   :  { %v962_v10 = vpop.f32.mrf.mxu0 }
 0x87b   :  { %v963_v11 = vadd.f32 %v2594_v7, %v962_v10  ;;  %v972_v12 = vadd.f32 %v968_v9, %v3092_v33 }
 0x87d   :  { %v976_v13 = vsel %vm37_vm0, %v972_v12, 0.0  ;;  %v971_v14 = vadd.f32 %v963_v11, %v3088_v31  ;;  %v95_v31 = vld [vmem:[#allocation2 + $0x78] sm:$0xff] }
 0x87e   :  { %977 = vadd.xlane.f32.xlu1 %v976_v13  ;;  %2798 = vmatprep.subr.mxu1 %v95_v31 }
 0x87f   :  { %v973_v15 = vsel %vm37_vm0, %v971_v14, 0.0  ;;  %2799 = vmatpush3.msra.mxu1 %v95_v31 }
 0x880   :  { %974 = vadd.xlane.f32.xlu0 %v973_v15  ;;  %2800 = vmatprep.subr.mxu1 %v94_v26 }
 0x881   :  { %2801 = vmatpush3.msra.mxu1 %v94_v26 }
 0x882   :  { %2802 = vmatprep.subr.mxu1 %v93_v27 }
 0x883   :  { %2803 = vmatpush3.msra.mxu1 %v93_v27 }
 0x907   :  { %v978_v16 = vpop.xlane.xlu1 %977 }
 0x908   :  { %v980_v17 = vmul.f32 0.03125, %v978_v16 }
 0x909   :  { %v975_v18 = vpop.xlane.xlu0 %974 }
 0x90a   :  { %v979_v19 = vmul.f32 0.03125, %v975_v18  ;;  %v982_v20 = vsub.f32 %v972_v12, %v980_v17  ;;  %v2602_v17 = vld [vmem:[#allocation2 + $0xcb] ss:$0 sm:$0xff] }
 0x90c   :  { %v981_v21 = vsub.f32 %v971_v14, %v979_v19  ;;  %v984_v24 = vmul.f32 %v982_v20, %v982_v20 }
 0x90e   :  { %v983_v22 = vmul.f32 %v981_v21, %v981_v21  ;;  %v988_v33 = vsel %vm37_vm0, %v984_v24, 0.0 }
 0x910   :  { %v985_v23 = vsel %vm37_vm0, %v983_v22, 0.0 }
 0x911   :  { %986 = vadd.xlane.f32.xlu0 %v985_v23 }
 0x915   :  { %989 = vadd.xlane.f32.xlu0 %v988_v33 }
 0x99a   :  { %v987_v28 = vpop.xlane.xlu0 %986 }
 0x99b   :  { %v991_v29 = vmul.f32 0.03125, %v987_v28 }
 0x99d   :  { %v993_v30 = vadd.f32 1e-12, %v991_v29 }
 0x99e   :  { %v990_v32 = vpop.xlane.xlu0 %989 }
 0x99f   :  { %2963 = vrsqrt.f32 %v993_v30  ;;  %v992_v35 = vmul.f32 0.03125, %v990_v32 }
 0x9a1   :  { %v994_v36 = vadd.f32 1e-12, %v992_v35 }
 0x9a3   :  { %2965 = vrsqrt.f32 %v994_v36 }
 0x9ac   :  { %v2964_v38 = vpop.eup %2963 }
 0x9ad   :  { %v997_v41 = vmul.f32 %v2964_v38, %v981_v21  ;;  %v1243_v38 = vld [vmem:[#allocation2 + $0xe8] sm:$0xff] }
 0x9ae   :  { %2826 = vmatprep.subr.mxu1 %v1243_v38 }
 0x9af   :  { %v1003_v44 = vmul.f32 %v2597_v40, %v997_v41  ;;  %v1241_v41 = vld [vmem:[#allocation2 + $0xd8] sm:$0xff] }
 0x9b0   :  { %v2966_v45 = vpop.eup %2965 }
 0x9b1   :  { %v998_v46 = vmul.f32 %v2966_v45, %v982_v20  ;;  %v3196_v47 = vadd.f32 %v2598_v43, %v1003_v44 }
 0x9b3   :  { %v1004_v48 = vmul.f32 %v2597_v40, %v998_v46  ;;  %2804 = vmatprep.mubr.msk.f32.mxu1 %vm37_vm0, %v3196_v47  ;;  %v1242_v40 = vld [vmem:[#allocation2 + $0xe0] sm:$0xff] }
 0x9b5   :  { %v1010_v49 = vadd.f32 %v2598_v43, %v1004_v48  ;;  %v1240_v43 = vld [vmem:[#allocation2 + $0xd0] sm:$0xff] }
 0x9b7   :  { %2805 = vmatmul.mubr.msk.f32.vlgmr.msra.gmra.mxu1 %vm37_vm0, %v1010_v49 }
 0x9b8   :  { %2827 = vmatpush3.msra.mxu1 %v1243_v38 }
 0x9b9   :  { %2828 = vmatprep.subr.mxu1 %v1242_v40 }
 0x9ba   :  { %2829 = vmatpush3.msra.mxu1 %v1242_v40 }
 0x9bb   :  { %2830 = vmatprep.subr.mxu1 %v1241_v41 }
 0x9bc   :  { %2831 = vmatpush3.msra.mxu1 %v1241_v41 }
 0x9bd   :  { %2832 = vmatprep.subr.mxu1 %v1240_v43 }
 0x9be   :  { %2833 = vmatpush3.msra.mxu1 %v1240_v43 }
 0x9bf   :  { %2837 = vmatprep.subr.mxu1 %v3036_v34 }
 0xa77   :  { %v2806_v60 = vpop.f32.mrf.mxu1 }
 0xa78   :  { %v1093_v61 = vadd.f32 %v2806_v60, %v2599_v59 }
 0xa79   :  { %v1087_v62 = vpop.f32.mrf.mxu1 }
 0xa7a   :  { %v1097_v39 = vmul.f32 %v1093_v61, %v1093_v61  ;;  %v1088_v63 = vadd.f32 %v2599_v59, %v1087_v62 }
 0xa7c   :  { %v1099_v0 = vmul.f32 %v1097_v39, %v1093_v61  ;;  %v1096_v1 = vmul.f32 %v1088_v63, %v1088_v63 }
 0xa7e   :  { %v1101_v2 = vmul.f32 0.044715, %v1099_v0  ;;  %v1098_v3 = vmul.f32 %v1096_v1, %v1088_v63 }
 0xa80   :  { %v1103_v4 = vadd.f32 %v1101_v2, %v1093_v61  ;;  %v1100_v5 = vmul.f32 0.044715, %v1098_v3 }
 0xa82   :  { %v1105_v6 = vmul.f32 0.7978846, %v1103_v4  ;;  %v1102_v7 = vadd.f32 %v1100_v5, %v1088_v63 }
 0xa84   :  { %2967 = vtanh.f32 %v1105_v6  ;;  %v1104_v8 = vmul.f32 0.7978846, %v1102_v7 }
 0xa86   :  { %2969 = vtanh.f32 %v1104_v8 }
 0xa91   :  { %v2968_v9 = vpop.eup %2967 }
 0xa92   :  { %v1109_v10 = vadd.f32 1.0, %v2968_v9 }
 0xa93   :  { %v2970_v11 = vpop.eup %2969 }
 0xa94   :  { %v1108_v12 = vadd.f32 1.0, %v2970_v11  ;;  %v1111_v13 = vmul.f32 0.5, %v1109_v10 }
 0xa96   :  { %v1110_v14 = vmul.f32 0.5, %v1108_v12  ;;  %v1113_v16 = vmul.f32 %v1111_v13, %v1093_v61  ;;  %v2607_v61 = vld [vmem:[#allocation2 + $0x170] ss:$0 sm:$0xff] }
 0xa98   :  { %v1112_v15 = vmul.f32 %v1110_v14, %v1088_v63 }
 0xa9a   :  { %2823 = vmatprep.mubr.msk.f32.mxu0 %vm1118_vm4, %v1112_v15 }
 0xa9b   :  { %2824 = vmatmul.mubr.msk.f32.vlgmr.msra.gmra.mxu0 %vm1118_vm4, %v1113_v16 }
 0xa9c   :  { %2849 = vmatprep.mubr.msk.f32.mxu0 %vm3037_vm1, %v3036_v34 }
 0xb5b   :  { %v2825_v18 = vpop.f32.mrf.mxu0 }
 0xb5c   :  { %v1197_v19 = vadd.f32 %v2825_v18, %v2602_v17 }
 0xb5d   :  { %v1191_v20 = vpop.f32.mrf.mxu0 }
 0xb5e   :  { %v1192_v21 = vadd.f32 %v2602_v17, %v1191_v20  ;;  %v1201_v22 = vadd.f32 %v1197_v19, %v1010_v49 }
 0xb60   :  { %v1205_v23 = vsel %vm37_vm0, %v1201_v22, 0.0  ;;  %v1200_v24 = vadd.f32 %v1192_v21, %v3196_v47 }
 0xb61   :  { %1206 = vadd.xlane.f32.xlu1 %v1205_v23 }
 0xb62   :  { %v1202_v33 = vsel %vm37_vm0, %v1200_v24, 0.0 }
 0xb63   :  { %1203 = vadd.xlane.f32.xlu0 %v1202_v33 }
 0xbea   :  { %v1207_v25 = vpop.xlane.xlu1 %1206 }
 0xbeb   :  { %v1209_v31 = vmul.f32 0.03125, %v1207_v25 }
 0xbec   :  { %v1204_v26 = vpop.xlane.xlu0 %1203 }
 0xbed   :  { %v1211_v27 = vsub.f32 %v1201_v22, %v1209_v31  ;;  %v1208_v28 = vmul.f32 0.03125, %v1204_v26 }
 0xbef   :  { %v1210_v29 = vsub.f32 %v1200_v24, %v1208_v28  ;;  %v1213_v30 = vmul.f32 %v1211_v27, %v1211_v27 }
 0xbf1   :  { %v1217_v32 = vsel %vm37_vm0, %v1213_v30, 0.0  ;;  %v1212_v35 = vmul.f32 %v1210_v29, %v1210_v29 }
 0xbf2   :  { %1218 = vadd.xlane.f32.xlu1 %v1217_v32 }
 0xbf3   :  { %v1214_v36 = vsel %vm37_vm0, %v1212_v35, 0.0 }
 0xbf4   :  { %1215 = vadd.xlane.f32.xlu0 %v1214_v36 }
 0xc7b   :  { %v1219_v44 = vpop.xlane.xlu1 %1218 }
 0xc7c   :  { %v1221_v45 = vmul.f32 0.03125, %v1219_v44 }
 0xc7d   :  { %v1216_v46 = vpop.xlane.xlu0 %1215 }
 0xc7e   :  { %v1223_v47 = vadd.f32 1e-12, %v1221_v45  ;;  %v1220_v48 = vmul.f32 0.03125, %v1216_v46 }
 0xc80   :  { %2971 = vrsqrt.f32 %v1223_v47  ;;  %v1222_v49 = vadd.f32 1e-12, %v1220_v48 }
 0xc82   :  { %2973 = vrsqrt.f32 %v1222_v49 }
 0xc8d   :  { %v2972_v51 = vpop.eup %2971 }
 0xc8e   :  { %v1227_v37 = vmul.f32 %v2972_v51, %v1211_v27 }
 0xc8f   :  { %v2974_v53 = vpop.eup %2973 }
 0xc90   :  { %v1226_v54 = vmul.f32 %v2974_v53, %v1210_v29  ;;  %v1233_v55 = vmul.f32 %v2605_v52, %v1227_v37 }
 0xc92   :  { %v1232_v58 = vmul.f32 %v2605_v52, %v1226_v54  ;;  %v3214_v60 = vadd.f32 %v2606_v57, %v1233_v55 }
 0xc94   :  { %v3212_v59 = vadd.f32 %v2606_v57, %v1232_v58 }
 0xc96   :  { %2834 = vmatprep.mubr.msk.f32.mxu1 %vm37_vm0, %v3212_v59 }
 0xc97   :  { %2835 = vmatmul.mubr.msk.f32.vlgmr.msra.gmra.mxu1 %vm37_vm0, %v3214_v60 }
 0xc98   :  { %2839 = vmatprep.mubr.msk.f32.mxu1 %vm3037_vm1, %v3036_v34 }
 0xd57   :  { %v2836_v62 = vpop.f32.mrf.mxu1 }
 0xd58   :  { %v3222_v39 = vadd.f32 %v2836_v62, %v2607_v61 }
 0xd59   :  { %v1344_v63 = vpop.f32.mrf.mxu1 }
 0xd5a   :  { %v3224_v0 = vadd.f32 %v2607_v61, %v1344_v63  ;;  %1431 = vrot.lane.b32.xlu1 %v3222_v39, %s3038_s0 }
 0xd5c   :  { %1354 = vrot.lane.b32.xlu0 %v3224_v0, %s3038_s0 }
 0xdcc   :  { %v1432_v2 = vpop.permute.xlu1 %1431 }
 0xdce   :  { %v1355_v1 = vpop.permute.xlu0 %1354 }
 0xdcf   :  { %2838 = vmatpush3.xpose.msk.msra.mxu1 %vm199_vm2, %v1355_v1 }
 0xdd0   :  { %2842 = vmatprep.subr.mxu1 %v3036_v34 }
 0xdd2   :  { %2840 = vmatmul.mubr.msk.f32.vlgmr.msra.gmra.mxu1 %vm199_vm2, %v3224_v0 }
 0xdd3   :  { %2843 = vmatpush3.xpose.msk.msra.mxu1 %vm199_vm2, %v1432_v2  ;;  %2844 = vmatprep.mubr.msk.f32.mxu1 %vm3037_vm1, %v3036_v34 }
 0xdd4   :  { %2852 = vmatprep.subr.mxu1 %v3036_v34 }
 0xdd6   :  { %2845 = vmatmul.mubr.msk.f32.vlgmr.msra.gmra.mxu1 %vm199_vm2, %v3222_v39 }
 0xdd7   :  { %2854 = vmatprep.mubr.msk.f32.mxu1 %vm3037_vm1, %v3036_v34 }
 0xe92   :  { %v1426_v3 = vpop.f32.mrf.mxu1 }
 0xe93   :  { %v1507_v4 = vmul.f32 0.25, %v1426_v3 }
 0xe94   :  { %v2841_v5 = vpop.f32.mrf.mxu1 }
 0xe95   :  { %v1509_v6 = vadd.f32 %v1507_v4, %v3129_v50 }
 0xe96   :  { %v1503_v7 = vpop.f32.mrf.mxu1 }
 0xe97   :  { %v1508_v8 = vmul.f32 0.25, %v1503_v7  ;;  %v1511_v9 = vsel %vm367_vm3, %v1509_v6, -inf }
 0xe98   :  { %1512 = vmax.xlane.f32.xlu1 %v1511_v9  ;;  %v2846_v10 = vpop.f32.mrf.mxu1  ;;  %v1247_v9 = vld [vmem:[#allocation2 + $0x100] sm:$0xff] }
 0xe99   :  { %v1510_v11 = vadd.f32 %v1508_v8, %v3132_v56  ;;  %v1248_v8 = vld [vmem:[#allocation2 + $0x108] sm:$0xff]  ;;  %v1245_v10 = vld [vmem:[#allocation2 + $0xf0] sm:$0xff] }
 0xe9b   :  { %v1514_v12 = vsel %vm367_vm3, %v1510_v11, -inf }
 0xe9c   :  { %1515 = vmax.xlane.f32.xlu0 %v1514_v12 }
 0xea9   :  { %1609 = vrot.lane.b32.xlu1 %v3222_v39, %s3039_s1 }
 0xead   :  { %1687 = vrot.lane.b32.xlu1 %v3224_v0, %s3040_s7 }
 0xeb1   :  { %1765 = vrot.lane.b32.xlu1 %v3222_v39, %s3040_s7 }
 0xf21   :  { %v1513_v13 = vpop.xlane.xlu1 %1512 }
 0xf22   :  { %v1517_v14 = vsub.f32 %v1509_v6, %v1513_v13 }
 0xf24   :  { %v1519_v15 = vmul.f32 1.442695, %v1517_v14 }
 0xf25   :  { %v1610_v16 = vpop.permute.xlu1 %1609  ;;  %v1516_v17 = vpop.xlane.xlu0 %1515 }
 0xf26   :  { %2975 = vpow2.f32 %v1519_v15  ;;  %v1518_v18 = vsub.f32 %v1510_v11, %v1516_v17  ;;  %2853 = vmatpush3.msra.mxu1 %v1610_v16 }
 0xf27   :  { %2862 = vmatprep.subr.mxu1 %v3036_v34 }
 0xf28   :  { %v1521_v19 = vmul.f32 1.442695, %v1518_v18 }
 0xf29   :  { %v1688_v24 = vpop.permute.xlu1 %1687 }
 0xf2a   :  { %2977 = vpow2.f32 %v1521_v19  ;;  %v2622_v19 = vld [vmem:[#allocation2 + $0x171] ss:$0 sm:$0xff] }
 0xf2d   :  { %v1766_v33 = vpop.permute.xlu1 %1765 }
 0xf33   :  { %v2976_v20 = vpop.eup %2975 }
 0xf34   :  { %v1523_v21 = vsel %vm367_vm3, %v2976_v20, 0.0 }
 0xf35   :  { %1524 = vadd.xlane.f32.xlu0 %v1523_v21 }
 0xf37   :  { %v2978_v22 = vpop.eup %2977 }
 0xf38   :  { %v1526_v23 = vsel %vm367_vm3, %v2978_v22, 0.0 }
 0xf39   :  { %1527 = vadd.xlane.f32.xlu1 %v1526_v23 }
 0xf4a   :  { %1763 = vrot.lane.b32.xlu1 %v3222_v39, %s3041_s8 }
 0xf4b   :  { %1533 = vrot.lane.b32.xlu0 %v3224_v0, %s3039_s1 }
 0xf4f   :  { %1685 = vrot.lane.b32.xlu0 %v3224_v0, %s3041_s8 }
 0xfbe   :  { %v1525_v25 = vpop.xlane.xlu0 %1524 }
 0xfbf   :  { %2979 = vrcp.f32 %v1525_v25 }
 0xfc2   :  { %v1528_v31 = vpop.xlane.xlu1 %1527  ;;  %v1534_v26 = vpop.permute.xlu0 %1533 }
 0xfc3   :  { %2981 = vrcp.f32 %v1528_v31  ;;  %2848 = vmatpush3.msra.mxu0 %v1534_v26 }
 0xfc4   :  { %2857 = vmatprep.subr.mxu0 %v3036_v34 }
 0xfc6   :  { %v1686_v32 = vpop.permute.xlu0 %1685  ;;  %v1764_v35 = vpop.permute.xlu1 %1763 }
 0xfcc   :  { %v2980_v27 = vpop.eup %2979 }
 0xfcd   :  { %v1531_v28 = vmul.f32 %v2980_v27, %v2976_v20 }
 0xfcf   :  { %2850 = vmatmul.mubr.msk.f32.vlgmr.msra.gmra.mxu0 %vm367_vm3, %v1531_v28 }
 0xfd0   :  { %v2982_v29 = vpop.eup %2981  ;;  %2858 = vmatpush3.xpose.msk.msra.mxu0 %vm199_vm2, %v1688_v24  ;;  %2859 = vmatprep.mubr.msk.f32.mxu0 %vm3037_vm1, %v3036_v34 }
 0xfd1   :  { %v1532_v30 = vmul.f32 %v2982_v29, %v2978_v22  ;;  %2867 = vmatprep.subr.mxu0 %v3036_v34 }
 0xfd3   :  { %2855 = vmatmul.mubr.msk.f32.vlgmr.msra.gmra.mxu1 %vm367_vm3, %v1532_v30  ;;  %2860 = vmatmul.mubr.msk.f32.vlgmr.msra.gmra.mxu0 %vm199_vm2, %v1686_v32 }
 0xfd4   :  { %2863 = vmatpush3.xpose.msk.msra.mxu1 %vm199_vm2, %v1766_v33  ;;  %2864 = vmatprep.mubr.msk.f32.mxu1 %vm3037_vm1, %v3036_v34 }
 0xfd5   :  { %2872 = vmatprep.subr.mxu1 %v3036_v34  ;;  %2869 = vmatprep.mubr.msk.f32.mxu0 %vm3037_vm1, %v3036_v34 }
 0xfd7   :  { %2865 = vmatmul.mubr.msk.f32.vlgmr.msra.gmra.mxu1 %vm199_vm2, %v1764_v35 }
 0xfd8   :  { %2874 = vmatprep.mubr.msk.f32.mxu1 %vm3037_vm1, %v3036_v34 }
0x108f   :  { %v3278_v36 = vpop.f32.mrf.mxu0 }
0x1091   :  { %v2851_v38 = vpop.f32.mrf.mxu0 }
0x1093   :  { %v3280_v40 = vpop.f32.mrf.mxu1  ;;  %v1759_v41 = vpop.f32.mrf.mxu0 }
0x1094   :  { %v1841_v43 = vmul.f32 0.25, %v1759_v41  ;;  %v1251_v41 = vld [vmem:[#allocation2 + $0x118] sm:$0xff] }
0x1095   :  { %v2856_v44 = vpop.f32.mrf.mxu1  ;;  %v2861_v45 = vpop.f32.mrf.mxu0 }
0x1096   :  { %v1843_v46 = vadd.f32 %v1841_v43, %v3129_v50  ;;  %v1250_v43 = vld [vmem:[#allocation2 + $0x110] sm:$0xff] }
0x1097   :  { %v1837_v47 = vpop.f32.mrf.mxu1 }
0x1098   :  { %v1842_v48 = vmul.f32 0.25, %v1837_v47  ;;  %v1845_v49 = vsel %vm367_vm3, %v1843_v46, -inf }
0x1099   :  { %1846 = vmax.xlane.f32.xlu0 %v1845_v49  ;;  %v2866_v51 = vpop.f32.mrf.mxu1 }
0x109a   :  { %v1844_v52 = vadd.f32 %v1842_v48, %v3132_v56 }
0x109c   :  { %v1848_v37 = vsel %vm367_vm3, %v1844_v52, -inf }
0x109d   :  { %1849 = vmax.xlane.f32.xlu1 %v1848_v37 }
0x10ae   :  { %1943 = vrot.lane.b32.xlu1 %v3222_v39, %s3042_s9 }
0x1122   :  { %v1847_v53 = vpop.xlane.xlu0 %1846 }
0x1123   :  { %v1851_v54 = vsub.f32 %v1843_v46, %v1847_v53  ;;  %v2626_v53 = vld [vmem:[#allocation2 + $0x175] ss:$0 sm:$0xff] }
0x1125   :  { %v1853_v55 = vmul.f32 1.442695, %v1851_v54 }
0x1126   :  { %v1850_v57 = vpop.xlane.xlu1 %1849 }
0x1127   :  { %2983 = vpow2.f32 %v1853_v55  ;;  %v1852_v50 = vsub.f32 %v1844_v52, %v1850_v57  ;;  %v2625_v52 = vld [vmem:[#allocation2 + $0x174] ss:$0 sm:$0xff] }
0x1129   :  { %v1855_v58 = vmul.f32 1.442695, %v1852_v50 }
0x112a   :  { %v1944_v61 = vpop.permute.xlu1 %1943 }
0x112b   :  { %2985 = vpow2.f32 %v1855_v58  ;;  %2873 = vmatpush3.msra.mxu1 %v1944_v61 }
0x1134   :  { %v2984_v62 = vpop.eup %2983 }
0x1135   :  { %v1857_v63 = vsel %vm367_vm3, %v2984_v62, 0.0 }
0x1136   :  { %1858 = vadd.xlane.f32.xlu0 %v1857_v63  ;;  %v1261_v63 = vld [vmem:[#allocation2 + $0x160] sm:$0xff] }
0x1138   :  { %v2986_v56 = vpop.eup %2985 }
0x1139   :  { %v1860_v1 = vsel %vm367_vm3, %v2986_v56, 0.0 }
0x113a   :  { %1861 = vadd.xlane.f32.xlu0 %v1860_v1  ;;  %v1259_v1 = vld [vmem:[#allocation2 + $0x150] sm:$0xff] }
0x1150   :  { %1867 = vrot.lane.b32.xlu0 %v3224_v0, %s3042_s9  ;;  %v1246_v0 = vld [vmem:[#allocation2 + $0xf8] sm:$0xff] }
0x11bf   :  { %v1859_v39 = vpop.xlane.xlu0 %1858 }
0x11c0   :  { %2987 = vrcp.f32 %v1859_v39  ;;  %v1258_v39 = vld [vmem:[#allocation2 + $0x148] sm:$0xff] }
0x11c3   :  { %v1862_v2 = vpop.xlane.xlu0 %1861 }
0x11c4   :  { %2989 = vrcp.f32 %v1862_v2  ;;  %v1257_v2 = vld [vmem:[#allocation2 + $0x140] sm:$0xff] }
0x11c7   :  { %v1868_v3 = vpop.permute.xlu0 %1867 }
0x11c8   :  { %2868 = vmatpush3.msra.mxu0 %v1868_v3  ;;  %v1256_v3 = vld [vmem:[#allocation2 + $0x138] sm:$0xff] }
0x11c9   :  { %2877 = vmatprep.subr.mxu0 %v1248_v8 }
0x11cd   :  { %v2988_v4 = vpop.eup %2987 }
0x11ce   :  { %v1865_v5 = vmul.f32 %v2988_v4, %v2984_v62  ;;  %v1262_v62 = vld [vmem:[#allocation2 + $0x168] sm:$0xff]  ;;  %v1255_v4 = vld [vmem:[#allocation2 + $0x130] sm:$0xff] }
0x11d0   :  { %2870 = vmatmul.mubr.msk.f32.vlgmr.msra.gmra.mxu0 %vm367_vm3, %v1865_v5  ;;  %v2627_v5 = vld [vmem:[#allocation2 + $0x172] ss:$0 sm:$0xff] }
0x11d1   :  { %v2990_v6 = vpop.eup %2989  ;;  %2878 = vmatpush3.msra.mxu0 %v1248_v8 }
0x11d2   :  { %v1866_v7 = vmul.f32 %v2990_v6, %v2986_v56  ;;  %2879 = vmatprep.subr.mxu0 %v1247_v9  ;;  %v1260_v56 = vld [vmem:[#allocation2 + $0x158] sm:$0xff] }
0x11d3   :  { %2880 = vmatpush3.msra.mxu0 %v1247_v9 }
0x11d4   :  { %2875 = vmatmul.mubr.msk.f32.vlgmr.msra.gmra.mxu1 %vm367_vm3, %v1866_v7  ;;  %2881 = vmatprep.subr.mxu0 %v1246_v0 }
0x11d5   :  { %2882 = vmatpush3.msra.mxu0 %v1246_v0 }
0x11d6   :  { %2883 = vmatprep.subr.mxu0 %v1245_v10 }
0x11d7   :  { %2884 = vmatpush3.msra.mxu0 %v1245_v10 }
0x11d8   :  { %2899 = vmatprep.subr.mxu0 %v1262_v62 }
0x1290   :  { %v1939_v11 = vpop.f32.mrf.mxu0 }
0x1291   :  { %2021 = vrot.lane.b32.xlu1 %v1939_v11, %s3043_s10 }
0x1292   :  { %v2871_v12 = vpop.f32.mrf.mxu0 }
0x1294   :  { %v2015_v13 = vpop.f32.mrf.mxu1 }
0x1295   :  { %2023 = vrot.lane.b32.xlu1 %v2015_v13, %s3043_s10 }
0x1296   :  { %v2876_v14 = vpop.f32.mrf.mxu1 }
0x1303   :  { %v2022_v15 = vpop.permute.xlu1 %2021 }
0x1304   :  { %v2027_v16 = vsel %vm199_vm2, %v3278_v36, %v2022_v15 }
0x1305   :  { %2885 = vmatprep.mubr.msk.f32.mxu0 %vm37_vm0, %v2027_v16 }
0x1307   :  { %v2024_v17 = vpop.permute.xlu1 %2023 }
0x1308   :  { %v2028_v18 = vsel %vm199_vm2, %v3280_v40, %v2024_v17  ;;  %v1253_v40 = vld [vmem:[#allocation2 + $0x128] sm:$0xff] }
0x1309   :  { %2886 = vmatmul.mubr.msk.f32.vlgmr.msra.gmra.mxu0 %vm37_vm0, %v2028_v18  ;;  %2888 = vmatprep.subr.mxu1 %v1253_v40 }
0x130a   :  { %2889 = vmatpush3.msra.mxu1 %v1253_v40  ;;  %2900 = vmatpush3.msra.mxu0 %v1262_v62 }
0x130b   :  { %2901 = vmatprep.subr.mxu0 %v1261_v63 }
0x130c   :  { %2902 = vmatpush3.msra.mxu0 %v1261_v63 }
0x130d   :  { %2903 = vmatprep.subr.mxu0 %v1260_v56 }
0x130e   :  { %2904 = vmatpush3.msra.mxu0 %v1260_v56 }
0x130f   :  { %2905 = vmatprep.subr.mxu0 %v1259_v1 }
0x1310   :  { %2906 = vmatpush3.msra.mxu0 %v1259_v1 }
0x1311   :  { %2907 = vmatprep.subr.mxu0 %v1258_v39 }
0x1312   :  { %2908 = vmatpush3.msra.mxu0 %v1258_v39  ;;  %v2634_v39 = vld [vmem:[#allocation2 + $0x177] ss:$0 sm:$0xff] }
0x1313   :  { %2909 = vmatprep.subr.mxu0 %v1257_v2 }
0x1314   :  { %2910 = vmatpush3.msra.mxu0 %v1257_v2 }
0x1315   :  { %2911 = vmatprep.subr.mxu0 %v1256_v3 }
0x1316   :  { %2912 = vmatpush3.msra.mxu0 %v1256_v3 }
0x1317   :  { %2913 = vmatprep.subr.mxu0 %v1255_v4 }
0x1318   :  { %2914 = vmatpush3.msra.mxu0 %v1255_v4 }
0x13c9   :  { %v2887_v20 = vpop.f32.mrf.mxu0 }
0x13ca   :  { %v2111_v21 = vadd.f32 %v2887_v20, %v2622_v19 }
0x13cb   :  { %v2105_v22 = vpop.f32.mrf.mxu0 }
0x13cc   :  { %v2106_v23 = vadd.f32 %v2622_v19, %v2105_v22  ;;  %v2115_v24 = vadd.f32 %v2111_v21, %v3214_v60 }
0x13ce   :  { %v2119_v33 = vsel %vm37_vm0, %v2115_v24, 0.0  ;;  %v2114_v25 = vadd.f32 %v2106_v23, %v3212_v59  ;;  %v1252_v59 = vld [vmem:[#allocation2 + $0x120] sm:$0xff] }
0x13cf   :  { %2120 = vadd.xlane.f32.xlu1 %v2119_v33  ;;  %2890 = vmatprep.subr.mxu1 %v1252_v59 }
0x13d0   :  { %v2116_v31 = vsel %vm37_vm0, %v2114_v25, 0.0  ;;  %2891 = vmatpush3.msra.mxu1 %v1252_v59 }
0x13d1   :  { %2117 = vadd.xlane.f32.xlu0 %v2116_v31  ;;  %2892 = vmatprep.subr.mxu1 %v1251_v41  ;;  %v2630_v31 = vld [vmem:[#allocation2 + $0x173] ss:$0 sm:$0xff] }
0x13d2   :  { %2893 = vmatpush3.msra.mxu1 %v1251_v41 }
0x13d3   :  { %2894 = vmatprep.subr.mxu1 %v1250_v43 }
0x13d4   :  { %2895 = vmatpush3.msra.mxu1 %v1250_v43 }
0x1458   :  { %v2121_v26 = vpop.xlane.xlu1 %2120 }
0x1459   :  { %v2123_v27 = vmul.f32 0.03125, %v2121_v26 }
0x145a   :  { %v2118_v28 = vpop.xlane.xlu0 %2117 }
0x145b   :  { %v2122_v29 = vmul.f32 0.03125, %v2118_v28  ;;  %v2125_v30 = vsub.f32 %v2115_v24, %v2123_v27 }
0x145d   :  { %v2124_v32 = vsub.f32 %v2114_v25, %v2122_v29  ;;  %v2127_v38 = vmul.f32 %v2125_v30, %v2125_v30 }
0x145f   :  { %v2126_v35 = vmul.f32 %v2124_v32, %v2124_v32  ;;  %v2131_v60 = vsel %vm37_vm0, %v2127_v38, 0.0 }
0x1461   :  { %v2128_v36 = vsel %vm37_vm0, %v2126_v35, 0.0 }
0x1462   :  { %2129 = vadd.xlane.f32.xlu0 %v2128_v36 }
0x1466   :  { %2132 = vadd.xlane.f32.xlu0 %v2131_v60 }
0x14eb   :  { %v2130_v44 = vpop.xlane.xlu0 %2129 }
0x14ec   :  { %v2134_v45 = vmul.f32 0.03125, %v2130_v44 }
0x14ee   :  { %v2136_v46 = vadd.f32 1e-12, %v2134_v45 }
0x14ef   :  { %v2133_v47 = vpop.xlane.xlu0 %2132 }
0x14f0   :  { %2991 = vrsqrt.f32 %v2136_v46  ;;  %v2135_v48 = vmul.f32 0.03125, %v2133_v47 }
0x14f2   :  { %v2137_v49 = vadd.f32 1e-12, %v2135_v48  ;;  %v2385_v48 = vld [vmem:[#allocation2 + $0x18] sm:$0xff] }
0x14f3   :  { %2918 = vmatprep.subr.mxu1 %v2385_v48 }
0x14f4   :  { %2993 = vrsqrt.f32 %v2137_v49  ;;  %v2384_v49 = vld [vmem:[#allocation2 + $0x10] sm:$0xff] }
0x14fd   :  { %v2992_v51 = vpop.eup %2991 }
0x14fe   :  { %v2140_v37 = vmul.f32 %v2992_v51, %v2124_v32  ;;  %v2383_v51 = vld [vmem:[#allocation2 + $0x8] sm:$0xff] }
0x1500   :  { %v2146_v54 = vmul.f32 %v2625_v52, %v2140_v37 }
0x1501   :  { %v2994_v55 = vpop.eup %2993 }
0x1502   :  { %v2141_v57 = vmul.f32 %v2994_v55, %v2125_v30  ;;  %v3308_v50 = vadd.f32 %v2626_v53, %v2146_v54 }
0x1504   :  { %v2147_v58 = vmul.f32 %v2625_v52, %v2141_v57  ;;  %2896 = vmatprep.mubr.msk.f32.mxu1 %vm37_vm0, %v3308_v50  ;;  %v2382_v52 = vld [vmem:[#allocation2] sm:$0xff] }
0x1506   :  { %v2153_v61 = vadd.f32 %v2626_v53, %v2147_v58 }
0x1508   :  { %2897 = vmatmul.mubr.msk.f32.vlgmr.msra.gmra.mxu1 %vm37_vm0, %v2153_v61 }
0x1509   :  { %2919 = vmatpush3.msra.mxu1 %v2385_v48 }
0x150a   :  { %2920 = vmatprep.subr.mxu1 %v2384_v49 }
0x150b   :  { %2921 = vmatpush3.msra.mxu1 %v2384_v49 }
0x150c   :  { %2922 = vmatprep.subr.mxu1 %v2383_v51 }
0x150d   :  { %2923 = vmatpush3.msra.mxu1 %v2383_v51 }
0x150e   :  { %2924 = vmatprep.subr.mxu1 %v2382_v52 }
0x150f   :  { %2925 = vmatpush3.msra.mxu1 %v2382_v52 }
0x15c8   :  { %v2898_v6 = vpop.f32.mrf.mxu1 }
0x15c9   :  { %v2236_v7 = vadd.f32 %v2898_v6, %v2627_v5  ;;  %v2635_v6 = vld [vmem:[#allocation2 + $0x20] ss:$0 sm:$0xff] }
0x15ca   :  { %v2230_v8 = vpop.f32.mrf.mxu1 }
0x15cb   :  { %v2240_v9 = vmul.f32 %v2236_v7, %v2236_v7  ;;  %v2231_v0 = vadd.f32 %v2627_v5, %v2230_v8  ;;  %v3323_v5 = vand.u32 127, %v355_v42  ;;  %v3044_v42 = vmov 0  }
0x15cc   :  { %2942 = vset.pattern.permute.xlu1 %v3044_v42  ;;  %2941 = vset.pattern.permute.xlu0 %v3044_v42 }
0x15cd   :  { %v2242_v10 = vmul.f32 %v2240_v9, %v2236_v7  ;;  %v2239_v11 = vmul.f32 %v2231_v0, %v2231_v0  ;;  %vm2478_vm5 = vcmp.lt.s32.totalorder %v3323_v5, 5  ;;  %vm2550_vm11 = vcmp.eq.s32.totalorder %v3323_v5, 0 }
0x15ce   :  { %vm2551_vm12 = vcmp.eq.s32.totalorder %v3323_v5, 1 }
0x15cf   :  { %v2244_v12 = vmul.f32 0.044715, %v2242_v10  ;;  %v2241_v13 = vmul.f32 %v2239_v11, %v2231_v0 }
0x15d1   :  { %v2246_v14 = vadd.f32 %v2244_v12, %v2236_v7  ;;  %v2243_v15 = vmul.f32 0.044715, %v2241_v13 }
0x15d3   :  { %v2248_v16 = vmul.f32 0.7978846, %v2246_v14  ;;  %v2245_v17 = vadd.f32 %v2243_v15, %v2231_v0 }
0x15d5   :  { %2995 = vtanh.f32 %v2248_v16  ;;  %v2247_v18 = vmul.f32 0.7978846, %v2245_v17  ;;  %v2474_v17 = vld [vmem:[%s3354_s2] sm:$0xff] }
0x15d6   :  { %vm2517_vm6 = vcmp.ne.s32.totalorder %v2474_v17, 4294967196 }
0x15d7   :  { %2997 = vtanh.f32 %v2247_v18 }
0x15e2   :  { %v2996_v19 = vpop.eup %2995 }
0x15e3   :  { %v2252_v20 = vadd.f32 1.0, %v2996_v19  ;;  %v2638_v19 = vsel %vm2517_vm6, 1.0, %v3036_v34 }
0x15e4   :  { %v2998_v21 = vpop.eup %2997 }
0x15e5   :  { %v2251_v22 = vadd.f32 1.0, %v2998_v21  ;;  %v2254_v23 = vmul.f32 0.5, %v2252_v20  ;;  %v2536_v20 = vsel %vm2535_vm7, %v2638_v19, 0.0 }
0x15e6   :  { %v2537_v21 = vrot.slane %v2536_v20, 4 }
0x15e7   :  { %v2253_v24 = vmul.f32 0.5, %v2251_v22  ;;  %v2256_v25 = vmul.f32 %v2254_v23, %v2236_v7 }
0x15e9   :  { %v2255_v33 = vmul.f32 %v2253_v24, %v2231_v0  ;;  %v2538_v24 = vadd.f32 %v2537_v21, %v2536_v20 }
0x15eb   :  { %2915 = vmatprep.mubr.msk.f32.mxu0 %vm1118_vm4, %v2255_v33  ;;  %v2539_v33 = vrot.slane %v2538_v24, 2 }
0x15ec   :  { %2916 = vmatmul.mubr.msk.f32.vlgmr.msra.gmra.mxu0 %vm1118_vm4, %v2256_v25 }
0x15ed   :  { %v2540_v25 = vadd.f32 %v2539_v33, %v2538_v24 }
0x16ac   :  { %v2917_v26 = vpop.f32.mrf.mxu0 }
0x16ad   :  { %v2339_v27 = vadd.f32 %v2917_v26, %v2630_v31  ;;  %v2475_v26 = vld [vmem:[%s3354_s2 + $0x8] sm:$0xff] }
0x16ae   :  { %v2333_v28 = vpop.f32.mrf.mxu0  ;;  %vm2518_vm8 = vcmp.ne.s32.totalorder %v2475_v26, 4294967196 }
0x16af   :  { %v2334_v29 = vadd.f32 %v2630_v31, %v2333_v28  ;;  %v2343_v30 = vadd.f32 %v2339_v27, %v2153_v61  ;;  %v2633_v61 = vld [vmem:[#allocation2 + $0x176] ss:$0 sm:$0xff]  ;;  %v2541_v31 = vrot.slane %v2540_v25, 1 }
0x16b1   :  { %v2347_v32 = vsel %vm37_vm0, %v2343_v30, 0.0  ;;  %v2342_v35 = vadd.f32 %v2334_v29, %v3308_v50  ;;  %v2542_v27 = vadd.f32 %v2541_v31, %v2540_v25 }
0x16b2   :  { %2348 = vadd.xlane.f32.xlu1 %v2347_v32 }
0x16b3   :  { %v2344_v36 = vsel %vm37_vm0, %v2342_v35, 0.0 }
0x16b4   :  { %2345 = vadd.xlane.f32.xlu0 %v2344_v36 }
0x173b   :  { %v2349_v38 = vpop.xlane.xlu1 %2348 }
0x173c   :  { %v2351_v60 = vmul.f32 0.03125, %v2349_v38 }
0x173d   :  { %v2346_v40 = vpop.xlane.xlu0 %2345 }
0x173e   :  { %v2353_v59 = vsub.f32 %v2343_v30, %v2351_v60  ;;  %v2350_v41 = vmul.f32 0.03125, %v2346_v40  ;;  %v2639_v30 = vsel %vm2518_vm8, 1.0, %v3036_v34 }
0x173f   :  { %v2543_v32 = vsel %vm2535_vm7, %v2639_v30, 0.0 }
0x1740   :  { %v2352_v43 = vsub.f32 %v2342_v35, %v2350_v41  ;;  %v2355_v44 = vmul.f32 %v2353_v59, %v2353_v59  ;;  %v2544_v36 = vrot.slane %v2543_v32, 4 }
0x1742   :  { %v2359_v45 = vsel %vm37_vm0, %v2355_v44, 0.0  ;;  %v2354_v46 = vmul.f32 %v2352_v43, %v2352_v43  ;;  %v2545_v44 = vadd.f32 %v2544_v36, %v2543_v32 }
0x1743   :  { %2360 = vadd.xlane.f32.xlu1 %v2359_v45 }
0x1744   :  { %v2356_v47 = vsel %vm37_vm0, %v2354_v46, 0.0  ;;  %v2546_v34 = vrot.slane %v2545_v44, 2 }
0x1745   :  { %2357 = vadd.xlane.f32.xlu0 %v2356_v47 }
0x1746   :  { %v2547_v48 = vadd.f32 %v2546_v34, %v2545_v44 }
0x1748   :  { %v2548_v49 = vrot.slane %v2547_v48, 1 }
0x174a   :  { %v2549_v51 = vadd.f32 %v2548_v49, %v2547_v48 }
0x17cc   :  { %v2361_v37 = vpop.xlane.xlu1 %2360 }
0x17cd   :  { %v2363_v53 = vmul.f32 0.03125, %v2361_v37 }
0x17ce   :  { %v2358_v54 = vpop.xlane.xlu0 %2357 }
0x17cf   :  { %v2365_v55 = vadd.f32 1e-12, %v2363_v53  ;;  %v2362_v57 = vmul.f32 0.03125, %v2358_v54 }
0x17d1   :  { %2999 = vrsqrt.f32 %v2365_v55  ;;  %v2364_v50 = vadd.f32 1e-12, %v2362_v57 }
0x17d3   :  { %3001 = vrsqrt.f32 %v2364_v50 }
0x17de   :  { %v3000_v58 = vpop.eup %2999 }
0x17df   :  { %v2369_v62 = vmul.f32 %v3000_v58, %v2353_v59 }
0x17e0   :  { %v3002_v63 = vpop.eup %3001 }
0x17e1   :  { %v2368_v56 = vmul.f32 %v3002_v63, %v2352_v43  ;;  %v2375_v1 = vmul.f32 %v2633_v61, %v2369_v62 }
0x17e3   :  { %v2374_v2 = vmul.f32 %v2633_v61, %v2368_v56  ;;  %v2381_v4 = vadd.f32 %v2634_v39, %v2375_v1 }
0x17e5   :  { %v2380_v3 = vadd.f32 %v2634_v39, %v2374_v2 }
0x17e7   :  { %2926 = vmatprep.mubr.msk.f32.mxu1 %vm37_vm0, %v2380_v3 }
0x17e8   :  { %2927 = vmatmul.mubr.msk.f32.vlgmr.msra.gmra.mxu1 %vm37_vm0, %v2381_v4 }
0x18a8   :  { %v2928_v7 = vpop.f32.mrf.mxu1 }
0x18a9   :  { %v2469_v8 = vadd.f32 %v2928_v7, %v2635_v6 }
0x18aa   :  { %v2463_v9 = vpop.f32.mrf.mxu1 }
0x18ab   :  { %2473 = vst [vmem:[%s3356_s4 + $0x8] sm:$0xff] %v2469_v8  ;;  %v2464_v0 = vadd.f32 %v2635_v6, %v2463_v9  ;;  %v2480_v10 = vsel %vm2478_vm5, %v2469_v8, -1e+09 }
0x18ac   :  { %2483 = vmax.xlane.f32.xlu1 %v2480_v10 }
0x18ad   :  { %2472 = vst [vmem:[%s3356_s4] sm:$0xff] %v2464_v0  ;;  %v2479_v11 = vsel %vm2478_vm5, %v2464_v0, -1e+09 }
0x18ae   :  { %2481 = vmax.xlane.f32.xlu0 %v2479_v11 }
0x1935   :  { %v2484_v12 = vpop.xlane.xlu1 %2483 }
0x1936   :  { %v2486_v13 = vsub.f32 %v2480_v10, %v2484_v12 }
0x1937   :  { %v2482_v14 = vpop.xlane.xlu0 %2481 }
0x1938   :  { %v2489_v15 = vmul.f32 1.442695, %v2486_v13  ;;  %v2485_v16 = vsub.f32 %v2479_v11, %v2482_v14 }
0x193a   :  { %3003 = vpow2.f32 %v2489_v15  ;;  %v2487_v18 = vmul.f32 1.442695, %v2485_v16 }
0x193c   :  { %3005 = vpow2.f32 %v2487_v18 }
0x1947   :  { %v3004_v22 = vpop.eup %3003 }
0x1948   :  { %2493 = vadd.xlane.f32.xlu1 %v3004_v22 }
0x1949   :  { %v3006_v23 = vpop.eup %3005 }
0x194a   :  { %2491 = vadd.xlane.f32.xlu0 %v3006_v23 }
0x1959   :  { %2505 = vperm.xlu1 %2942, %v2475_v26  }
0x195d   :  { %2554 = vperm.xlu1 %2942, %v2542_v27  }
0x1960   :  { %2502 = vperm.xlu0 %2941, %v2474_v17  }
0x19d1   :  { %v2494_v28 = vpop.xlane.xlu1 %2493 }
0x19d2   :  { %3007 = vlog2.f32 %v2494_v28 }
0x19d3   :  { %v2492_v29 = vpop.xlane.xlu0 %2491 }
0x19d4   :  { %3009 = vlog2.f32 %v2492_v29 }
0x19d5   :  { %v2506_v60 = vpop.permute.xlu1 %2505 }
0x19d6   :  { %vm2508_vm9 = vcmp.eq.s32.totalorder %v3323_v5, %v2506_v60 }
0x19d9   :  { %v2555_v52 = vpop.permute.xlu1 %2554 }
0x19da   :  { %v2562_v9 = vsel %vm2551_vm12, %v2555_v52, 0.0 }
0x19db   :  { %v2503_v40 = vpop.permute.xlu0 %2502 }
0x19dc   :  { %vm2507_vm10 = vcmp.eq.s32.totalorder %v3323_v5, %v2503_v40 }
0x19df   :  { %v3008_v35 = vpop.eup %3007 }
0x19e0   :  { %v2498_v38 = vmul.f32 0.6931472, %v3008_v35 }
0x19e1   :  { %v3010_v59 = vpop.eup %3009 }
0x19e2   :  { %v2496_v41 = vmul.f32 0.6931472, %v3010_v59  ;;  %v2500_v43 = vsub.f32 %v2486_v13, %v2498_v38 }
0x19e4   :  { %v2510_v45 = vsel %vm2508_vm9, %v2500_v43, 0.0  ;;  %v2499_v46 = vsub.f32 %v2485_v16, %v2496_v41 }
0x19e5   :  { %2513 = vadd.xlane.f32.xlu0 %v2510_v45 }
0x19e6   :  { %v2509_v47 = vsel %vm2507_vm10, %v2499_v46, 0.0 }
0x19e7   :  { %2511 = vadd.xlane.f32.xlu1 %v2509_v47 }
0x19f8   :  { %2559 = vperm.xlu1 %2942, %v2549_v51  }
0x1a6e   :  { %v2514_v37 = vpop.xlane.xlu0 %2513 }
0x1a6f   :  { %v2516_v53 = vsub.f32 0.0, %v2514_v37 }
0x1a70   :  { %v2512_v54 = vpop.xlane.xlu1 %2511 }
0x1a71   :  { %v2529_v55 = vrot.slane %v2516_v53, 4  ;;  %v2515_v57 = vsub.f32 0.0, %v2512_v54 }
0x1a73   :  { %v2530_v50 = vadd.f32 %v2529_v55, %v2516_v53  ;;  %v2523_v58 = vrot.slane %v2515_v57, 4 }
0x1a74   :  { %v2560_v2 = vpop.permute.xlu1 %2559 }
0x1a75   :  { %v2531_v61 = vrot.slane %v2530_v50, 2  ;;  %v2524_v62 = vadd.f32 %v2523_v58, %v2515_v57  ;;  %v2563_v6 = vsel %vm2551_vm12, %v2560_v2, 0.0 }
0x1a77   :  { %v2532_v63 = vadd.f32 %v2531_v61, %v2530_v50  ;;  %v2525_v56 = vrot.slane %v2524_v62, 2 }
0x1a79   :  { %v2533_v1 = vrot.slane %v2532_v63, 1  ;;  %v2526_v39 = vadd.f32 %v2525_v56, %v2524_v62 }
0x1a7b   :  { %v2534_v3 = vadd.f32 %v2533_v1, %v2532_v63  ;;  %v2527_v4 = vrot.slane %v2526_v39, 1 }
0x1a7d   :  { %v2528_v7 = vadd.f32 %v2527_v4, %v2526_v39  ;;  %v2565_v8 = vsel %vm2550_vm11, %v2534_v3, %v2563_v6 }
0x1a7e   :  { %2567 = vst [vmem:[%s3357_s5 + $0x1] sm:$0x1] %v2565_v8 }
0x1a7f   :  { %v2564_v0 = vsel %vm2550_vm11, %v2528_v7, %v2562_v9 }
0x1a80   :  { %2566 = vst [vmem:[%s3357_s5] sm:$0x1] %v2564_v0 }
0x1a81   :  { %2576 = vsyncpa [#allocation3], 1 }

</bundles_post_ra>
